<compile_context>
chip_gen: v5e
topology: v5e:2x2
jax: 0.10.0
libtpu: 0.0.40
codegen_flags: <defaults>
</compile_context>

<pallas_src>
import math
from functools import partial

import jax
import jax.numpy as jnp
from jax.experimental import pallas as pl
from jax.experimental.pallas import tpu as pltpu


_INV_SQRT2 = 0.7071067811865476
_SQRT_2_OVER_PI = 0.7978845608028654


def _vmem_budget_bytes():
    # ~75% of physical VMEM: ~96 MiB on v5e/v6e (128 MiB), ~48 MiB on v7x (64 MiB).
    try:
        cap = int(pltpu.get_tpu_info().vmem_capacity_bytes)
    except Exception:
        cap = 64 * 1024 * 1024          # conservative fallback (safe on every generation)
    return (cap * 3) // 4


# ---------------------------------------------------------------------------------------------
# fused TTE block kernel: one temporal sequence (N frames, C channels) per grid step
# ---------------------------------------------------------------------------------------------
def _tte_block_kernel(scale, eps, num_heads, head_dim, exact_gelu,
                      x_ref, pos_ref,
                      g1_ref, b1_ref, wqkv_ref, bqkv_ref, wproj_ref, bproj_ref,
                      g2_ref, b2_ref, wfc1_ref, bfc1_ref, wfc2_ref, bfc2_ref,
                      gf_ref, bf_ref, o_ref):
    C = num_heads * head_dim
    cdt = wqkv_ref.dtype                      # MXU operand dtype (bf16 default); math in f32

    def layer_norm(z, g_ref, b_ref):          # z: (N, C) f32
        mu = jnp.mean(z, axis=-1, keepdims=True)
        d = z - mu
        var = jnp.mean(d * d, axis=-1, keepdims=True)
        return d * jax.lax.rsqrt(var + eps) * g_ref[...] + b_ref[...]

    x = x_ref[0].astype(jnp.float32)                          # (N, C)
    x0 = x + pos_ref[...].astype(jnp.float32)                 # + temporal_pos_embed (pos_drop p=0)

    # ---- Attention(norm1(x)), comb=False ----
    y1 = layer_norm(x0, g1_ref, b1_ref).astype(cdt)
    qkv = jnp.dot(y1, wqkv_ref[...], preferred_element_type=jnp.float32) + bqkv_ref[...]
    q = qkv[:, :C] * scale                                     # fold scale into q (N*dh, not N*N)
    k = qkv[:, C:2 * C]
    v = qkv[:, 2 * C:]

    # Heads stay packed on the lane dim. The output projection is decomposed per head:
    #   concat_h(head_h) @ Wp  ==  sum_h head_h @ Wp[h*dh:(h+1)*dh, :]
    # so no lane-dim concat / relayout is ever materialized.
    wp = wproj_ref[...]
    acc = jnp.zeros_like(x0)
    for h in range(num_heads):
        sl = slice(h * head_dim, (h + 1) * head_dim)
        qh = q[:, sl].astype(cdt)
        kh = k[:, sl].astype(cdt)
        vh = v[:, sl].astype(cdt)
        s = jnp.einsum("qd,kd->qk", qh, kh, preferred_element_type=jnp.float32)
        s = s - jnp.max(s, axis=-1, keepdims=True)
        p = jnp.exp(s)
        p = p * pl.reciprocal(jnp.sum(p, axis=-1, keepdims=True), approx=True)  # attn_drop p=0
        oh = jnp.einsum("qk,kd->qd", p.astype(cdt), vh, preferred_element_type=jnp.float32)
        acc = acc + jnp.dot(oh.astype(cdt), wp[sl, :], preferred_element_type=jnp.float32)
    x1 = x0 + acc + bproj_ref[...]                             # residual (drop_path / proj_drop p=0)

    # ---- Mlp(norm2(x)) ----
    y2 = layer_norm(x1, g2_ref, b2_ref).astype(cdt)
    hdn = jnp.dot(y2, wfc1_ref[...], preferred_element_type=jnp.float32) + bfc1_ref[...]
    if exact_gelu:
        hdn = 0.5 * hdn * (1.0 + jax.lax.erf(hdn * _INV_SQRT2))     # PyTorch nn.GELU default
    else:  # tanh approximation -> EUP slot (cheaper next to the MXU work)
        hdn = 0.5 * hdn * (1.0 + jnp.tanh(_SQRT_2_OVER_PI * (hdn + 0.044715 * hdn * hdn * hdn)))
    m = jnp.dot(hdn.astype(cdt), wfc2_ref[...], preferred_element_type=jnp.float32) + bfc2_ref[...]
    x2 = x1 + m

    # ---- Temporal_norm ----
    o_ref[0] = layer_norm(x2, gf_ref, bf_ref).astype(o_ref.dtype)


# ---------------------------------------------------------------------------------------------
# TTE forward
# ---------------------------------------------------------------------------------------------
@partial(jax.jit, static_argnames=("num_heads", "ln_eps", "compute_dtype", "exact_gelu"))
def tte_forward_pallas(x, params, *, num_heads, ln_eps=1e-6,
                       compute_dtype=jnp.bfloat16, exact_gelu=True):
    """x: (b, f, n, c) float32 -> (b, f, n, c) float32."""
    b, f, n, c = x.shape
    dh = c // num_heads
    scale = dh ** (-0.5)
    cdt = jnp.dtype(compute_dtype)

    # (b, f, n, c) -> (b*n, f, c): one XLA transpose in, one out (inherent to the module I/O).
    xt = jnp.transpose(x, (0, 2, 1, 3)).reshape(b * n, f, c).astype(jnp.float32)
    B, N, C = xt.shape
    Hd = params["w_fc1"].shape[1]

    pos = params["pos_embed"].astype(jnp.float32)                             # (N, C)
    g1 = params["ln1_g"].reshape(1, C).astype(jnp.float32)
    b1 = params["ln1_b"].reshape(1, C).astype(jnp.float32)
    g2 = params["ln2_g"].reshape(1, C).astype(jnp.float32)
    b2 = params["ln2_b"].reshape(1, C).astype(jnp.float32)
    gf = params["lnf_g"].reshape(1, C).astype(jnp.float32)
    bf = params["lnf_b"].reshape(1, C).astype(jnp.float32)
    wqkv = params["w_qkv"].astype(cdt)
    bqkv = params["b_qkv"].reshape(1, 3 * C).astype(jnp.float32)
    wproj = params["w_proj"].astype(cdt)
    bproj = params["b_proj"].reshape(1, C).astype(jnp.float32)
    wfc1 = params["w_fc1"].astype(cdt)
    bfc1 = params["b_fc1"].reshape(1, Hd).astype(jnp.float32)
    wfc2 = params["w_fc2"].astype(cdt)
    bfc2 = params["b_fc2"].reshape(1, C).astype(jnp.float32)

    # VMEM footprint check (weights are still double-buffered by the pipeline even though
    # their block index never changes -- see TODO at top of file).
    budget = _vmem_budget_bytes()
    isz = cdt.itemsize
    resident = 2 * ((C * 3 * C + C * C + C * Hd + Hd * C) * isz
                    + (3 * C + 8 * C + Hd) * 4 + N * C * 4)
    per_step = 4 * N * C * 4 + (3 * N * C + 2 * N * Hd + 8 * N * C + 2 * N * N) * 4
    if resident + per_step > budget:
        # TODO(synk): add a hidden-dim grid axis + flash-style KV-tiled online softmax once a
        # single sequence's fused block no longer fits the scoped-VMEM budget.
        raise ValueError("tte_forward_pallas: fused block exceeds the VMEM budget")

    cost = pl.CostEstimate(
        flops=int(2 * B * N * (3 * C * C + 2 * N * C + C * C + 2 * C * Hd)),
        transcendentals=int(B * N * (num_heads * N + Hd)),
        bytes_accessed=int(2 * B * N * C * 4 + resident // 2),
    )

    def const_spec(shape):
        return pl.BlockSpec(shape, lambda i: (0,) * len(shape))

    out = pl.pallas_call(
        partial(_tte_block_kernel, float(scale), float(ln_eps), num_heads, dh, exact_gelu),
        out_shape=jax.ShapeDtypeStruct((B, N, C), jnp.float32),
        grid_spec=pltpu.PrefetchScalarGridSpec(
            num_scalar_prefetch=0,
            grid=(B,),                   # b*n >= 2 steps -> both v7x TensorCores get work
            in_specs=[
                pl.BlockSpec((1, N, C), lambda i: (i, 0, 0)),    # x (one sequence per step)
                const_spec((N, C)),                              # temporal_pos_embed
                const_spec((1, C)), const_spec((1, C)),          # norm1 gamma / beta
                const_spec((C, 3 * C)), const_spec((1, 3 * C)),  # qkv weight / bias
                const_spec((C, C)), const_spec((1, C)),          # proj weight / bias
                const_spec((1, C)), const_spec((1, C)),          # norm2 gamma / beta
                const_spec((C, Hd)), const_spec((1, Hd)),        # fc1 weight / bias
                const_spec((Hd, C)), const_spec((1, C)),         # fc2 weight / bias
                const_spec((1, C)), const_spec((1, C)),          # Temporal_norm gamma / beta
            ],
            out_specs=pl.BlockSpec((1, N, C), lambda i: (i, 0, 0)),
        ),
        compiler_params=pltpu.CompilerParams(
            dimension_semantics=("parallel",),
            vmem_limit_bytes=int(budget),
        ),
        cost_estimate=cost,
    )(xt, pos, g1, b1, wqkv, bqkv, wproj, bproj, g2, b2, wfc1, bfc1, wfc2, bfc2, gf, bf)

    # (b*n, f, c) -> (b, f, n, c)
    return jnp.transpose(out.reshape(b, n, f, c), (0, 2, 1, 3))


# ---------------------------------------------------------------------------------------------
# pure-JAX reference (mirrors the PyTorch forward exactly)
# ---------------------------------------------------------------------------------------------
def tte_forward_reference(x, params, *, num_heads, ln_eps=1e-6):
    b, f, n, c = x.shape
    dh = c // num_heads
    scale = dh ** (-0.5)

    def ln(z, g, bta):
        mu = jnp.mean(z, axis=-1, keepdims=True)
        var = jnp.mean((z - mu) ** 2, axis=-1, keepdims=True)
        return (z - mu) / jnp.sqrt(var + ln_eps) * g + bta

    xt = jnp.transpose(x, (0, 2, 1, 3)).reshape(b * n, f, c)
    xt = xt + params["pos_embed"][None]
    B, N, C = xt.shape

    y1 = ln(xt, params["ln1_g"], params["ln1_b"])
    qkv = jnp.einsum("bnc,cd->bnd", y1, params["w_qkv"]) + params["b_qkv"]
    qkv = jnp.transpose(qkv.reshape(B, N, 3, num_heads, dh), (2, 0, 3, 1, 4))
    q, k, v = qkv[0], qkv[1], qkv[2]
    attn = jnp.einsum("bhqd,bhkd->bhqk", q, k) * scale
    attn = jax.nn.softmax(attn, axis=-1)
    a = jnp.einsum("bhqk,bhkd->bhqd", attn, v)
    a = jnp.transpose(a, (0, 2, 1, 3)).reshape(B, N, C)
    a = jnp.einsum("bnc,cd->bnd", a, params["w_proj"]) + params["b_proj"]
    xt = xt + a

    y2 = ln(xt, params["ln2_g"], params["ln2_b"])
    h = jnp.einsum("bnc,ch->bnh", y2, params["w_fc1"]) + params["b_fc1"]
    h = 0.5 * h * (1.0 + jax.lax.erf(h / jnp.sqrt(2.0)))
    m = jnp.einsum("bnh,ho->bno", h, params["w_fc2"]) + params["b_fc2"]
    xt = xt + m

    out = ln(xt, params["lnf_g"], params["lnf_b"])
    return jnp.transpose(out.reshape(b, n, f, c), (0, 2, 1, 3))


if __name__ == "__main__":
    # Small shapes consistent with TTE: x is (batch, frames, joints, embed_dim_ratio).
    # NOTE: real MixSTE uses C>=256 (lane-dense); C=32 here only keeps the test small.
    b, f, n, c = 2, 16, 8, 32
    num_heads = 4
    hidden = int(c * 4.0)   # mlp_ratio = 4.0 -> 128

    key = jax.random.PRNGKey(0)
    ks = jax.random.split(key, 10)
    s = 0.02
    x = jax.random.normal(ks[0], (b, f, n, c), dtype=jnp.float32)
    params = dict(
        pos_embed=jax.random.normal(ks[1], (f, c), jnp.float32) * s,
        ln1_g=jnp.ones((c,), jnp.float32), ln1_b=jnp.zeros((c,), jnp.float32),
        ln2_g=jnp.ones((c,), jnp.float32), ln2_b=jnp.zeros((c,), jnp.float32),
        lnf_g=jnp.ones((c,), jnp.float32), lnf_b=jnp.zeros((c,), jnp.float32),
        w_qkv=jax.random.normal(ks[2], (c, 3 * c), jnp.float32) * s,
        b_qkv=jax.random.normal(ks[3], (3 * c,), jnp.float32) * s,
        w_proj=jax.random.normal(ks[4], (c, c), jnp.float32) * s,
        b_proj=jax.random.normal(ks[5], (c,), jnp.float32) * s,
        w_fc1=jax.random.normal(ks[6], (c, hidden), jnp.float32) * s,
        b_fc1=jax.random.normal(ks[7], (hidden,), jnp.float32) * s,
        w_fc2=jax.random.normal(ks[8], (hidden, c), jnp.float32) * s,
        b_fc2=jax.random.normal(ks[9], (c,), jnp.float32) * s,
    )

    with jax.default_matmul_precision("highest"):
        ref = jax.block_until_ready(tte_forward_reference(x, params, num_heads=num_heads))

    # f32-operand path (exact-GELU / exact-LN; tight tolerance)
    out_f32 = jax.block_until_ready(
        tte_forward_pallas(x, params, num_heads=num_heads, compute_dtype=jnp.float32))
    assert out_f32.shape == (b, f, n, c)
    err32 = float(jnp.max(jnp.abs(out_f32 - ref)))
    assert jnp.allclose(out_f32, ref, atol=5e-3, rtol=5e-3), f"f32 path max abs err {err32}"

    # default path: bf16 MXU operands, f32 accumulation / LN / softmax / GELU
    out_bf16 = jax.block_until_ready(tte_forward_pallas(x, params, num_heads=num_heads))
    assert bool(jnp.all(jnp.isfinite(out_bf16)))
    err16 = float(jnp.max(jnp.abs(out_bf16 - ref)))
    assert jnp.allclose(out_bf16, ref, atol=5e-2, rtol=5e-2), f"bf16 path max abs err {err16}"

    print("KERNEL_OK")
</pallas_src>

<mosaic_0001>
module attributes {stable_mosaic.version = 11 : i64} {
  func.func @_tte_block_kernel(%arg0: i32, %arg1: memref<1x16x32xf32, #tpu.memory_space<vmem>>, %arg2: memref<16x32xf32, #tpu.memory_space<vmem>>, %arg3: memref<1x32xf32, #tpu.memory_space<vmem>>, %arg4: memref<1x32xf32, #tpu.memory_space<vmem>>, %arg5: memref<32x96xf32, #tpu.memory_space<vmem>>, %arg6: memref<1x96xf32, #tpu.memory_space<vmem>>, %arg7: memref<32x32xf32, #tpu.memory_space<vmem>>, %arg8: memref<1x32xf32, #tpu.memory_space<vmem>>, %arg9: memref<1x32xf32, #tpu.memory_space<vmem>>, %arg10: memref<1x32xf32, #tpu.memory_space<vmem>>, %arg11: memref<32x128xf32, #tpu.memory_space<vmem>>, %arg12: memref<1x128xf32, #tpu.memory_space<vmem>>, %arg13: memref<128x32xf32, #tpu.memory_space<vmem>>, %arg14: memref<1x32xf32, #tpu.memory_space<vmem>>, %arg15: memref<1x32xf32, #tpu.memory_space<vmem>>, %arg16: memref<1x32xf32, #tpu.memory_space<vmem>>, %arg17: memref<1x16x32xf32, #tpu.memory_space<vmem>>) attributes {dimension_semantics = [#tpu.dimension_semantics<parallel>], iteration_bounds = array<i64: 16>, scalar_prefetch = 0 : i64, scratch_operands = 0 : i64, tpu.core_type = #tpu.core_type<tc>, window_params = [{transform_indices = @transform_0, window_bounds = array<i64: 1, 16, 32>}, {pipeline_mode = #tpu.pipeline_mode<synchronous>, transform_indices = @transform_1, window_bounds = array<i64: 16, 32>}, {pipeline_mode = #tpu.pipeline_mode<synchronous>, transform_indices = @transform_2, window_bounds = array<i64: 1, 32>}, {pipeline_mode = #tpu.pipeline_mode<synchronous>, transform_indices = @transform_3, window_bounds = array<i64: 1, 32>}, {pipeline_mode = #tpu.pipeline_mode<synchronous>, transform_indices = @transform_4, window_bounds = array<i64: 32, 96>}, {pipeline_mode = #tpu.pipeline_mode<synchronous>, transform_indices = @transform_5, window_bounds = array<i64: 1, 96>}, {pipeline_mode = #tpu.pipeline_mode<synchronous>, transform_indices = @transform_6, window_bounds = array<i64: 32, 32>}, {pipeline_mode = #tpu.pipeline_mode<synchronous>, transform_indices = @transform_7, window_bounds = array<i64: 1, 32>}, {pipeline_mode = #tpu.pipeline_mode<synchronous>, transform_indices = @transform_8, window_bounds = array<i64: 1, 32>}, {pipeline_mode = #tpu.pipeline_mode<synchronous>, transform_indices = @transform_9, window_bounds = array<i64: 1, 32>}, {pipeline_mode = #tpu.pipeline_mode<synchronous>, transform_indices = @transform_10, window_bounds = array<i64: 32, 128>}, {pipeline_mode = #tpu.pipeline_mode<synchronous>, transform_indices = @transform_11, window_bounds = array<i64: 1, 128>}, {pipeline_mode = #tpu.pipeline_mode<synchronous>, transform_indices = @transform_12, window_bounds = array<i64: 128, 32>}, {pipeline_mode = #tpu.pipeline_mode<synchronous>, transform_indices = @transform_13, window_bounds = array<i64: 1, 32>}, {pipeline_mode = #tpu.pipeline_mode<synchronous>, transform_indices = @transform_14, window_bounds = array<i64: 1, 32>}, {pipeline_mode = #tpu.pipeline_mode<synchronous>, transform_indices = @transform_15, window_bounds = array<i64: 1, 32>}, {transform_indices = @transform_16, window_bounds = array<i64: 1, 16, 32>}]} {
    %c0 = arith.constant 0 : index
    %c0_0 = arith.constant 0 : index
    %c0_1 = arith.constant 0 : index
    %0 = vector.load %arg1[%c0, %c0_0, %c0_1] : memref<1x16x32xf32, #tpu.memory_space<vmem>>, vector<1x16x32xf32>
    %1 = vector.shape_cast %0 : vector<1x16x32xf32> to vector<16x32xf32>
    %c0_2 = arith.constant 0 : index
    %c0_3 = arith.constant 0 : index
    %2 = vector.load %arg2[%c0_2, %c0_3] : memref<16x32xf32, #tpu.memory_space<vmem>>, vector<16x32xf32>
    %3 = arith.addf %1, %2 : vector<16x32xf32>
    %cst = arith.constant dense<0.000000e+00> : vector<16xf32>
    %4 = vector.multi_reduction <add>, %3, %cst [1] : vector<16x32xf32> to vector<16xf32>
    %5 = vector.shape_cast %4 : vector<16xf32> to vector<16x1xf32>
    %cst_4 = arith.constant 3.200000e+01 : f32
    %6 = vector.broadcast %cst_4 : f32 to vector<16x1xf32>
    %7 = arith.divf %5, %6 : vector<16x1xf32>
    %8 = vector.broadcast %7 : vector<16x1xf32> to vector<16x32xf32>
    %9 = arith.subf %3, %8 : vector<16x32xf32>
    %10 = arith.mulf %9, %9 : vector<16x32xf32>
    %cst_5 = arith.constant dense<0.000000e+00> : vector<16xf32>
    %11 = vector.multi_reduction <add>, %10, %cst_5 [1] : vector<16x32xf32> to vector<16xf32>
    %12 = vector.shape_cast %11 : vector<16xf32> to vector<16x1xf32>
    %cst_6 = arith.constant 3.200000e+01 : f32
    %13 = vector.broadcast %cst_6 : f32 to vector<16x1xf32>
    %14 = arith.divf %12, %13 : vector<16x1xf32>
    %cst_7 = arith.constant 9.99999997E-7 : f32
    %15 = vector.broadcast %cst_7 : f32 to vector<16x1xf32>
    %16 = arith.addf %14, %15 : vector<16x1xf32>
    %17 = math.rsqrt %16 : vector<16x1xf32>
    %18 = vector.broadcast %17 : vector<16x1xf32> to vector<16x32xf32>
    %19 = arith.mulf %9, %18 : vector<16x32xf32>
    %c0_8 = arith.constant 0 : index
    %c0_9 = arith.constant 0 : index
    %20 = vector.load %arg3[%c0_8, %c0_9] : memref<1x32xf32, #tpu.memory_space<vmem>>, vector<1x32xf32>
    %21 = vector.broadcast %20 : vector<1x32xf32> to vector<16x32xf32>
    %22 = arith.mulf %19, %21 : vector<16x32xf32>
    %c0_10 = arith.constant 0 : index
    %c0_11 = arith.constant 0 : index
    %23 = vector.load %arg4[%c0_10, %c0_11] : memref<1x32xf32, #tpu.memory_space<vmem>>, vector<1x32xf32>
    %24 = vector.broadcast %23 : vector<1x32xf32> to vector<16x32xf32>
    %25 = arith.addf %22, %24 : vector<16x32xf32>
    %c0_12 = arith.constant 0 : index
    %c0_13 = arith.constant 0 : index
    %26 = vector.load %arg5[%c0_12, %c0_13] : memref<32x96xf32, #tpu.memory_space<vmem>>, vector<32x96xf32>
    %cst_14 = arith.constant dense<0.000000e+00> : vector<16x96xf32>
    %27 = tpu.matmul %25, %26, %cst_14 {dimension_numbers = #tpu.dot_dimension_numbers<[1], [0], [0], [1], [0, 0, 1, 1], [], []>} : vector<16x32xf32>, vector<32x96xf32>, vector<16x96xf32> -> vector<16x96xf32>
    %c0_15 = arith.constant 0 : index
    %c0_16 = arith.constant 0 : index
    %28 = vector.load %arg6[%c0_15, %c0_16] : memref<1x96xf32, #tpu.memory_space<vmem>>, vector<1x96xf32>
    %29 = vector.broadcast %28 : vector<1x96xf32> to vector<16x96xf32>
    %30 = arith.addf %27, %29 : vector<16x96xf32>
    %31 = vector.extract_strided_slice %30 {offsets = [0, 0], sizes = [16, 32], strides = [1, 1]} : vector<16x96xf32> to vector<16x32xf32>
    %cst_17 = arith.constant 0.353553385 : f32
    %32 = vector.broadcast %cst_17 : f32 to vector<16x32xf32>
    %33 = arith.mulf %31, %32 : vector<16x32xf32>
    %34 = vector.extract_strided_slice %30 {offsets = [0, 32], sizes = [16, 32], strides = [1, 1]} : vector<16x96xf32> to vector<16x32xf32>
    %35 = vector.extract_strided_slice %30 {offsets = [0, 64], sizes = [16, 32], strides = [1, 1]} : vector<16x96xf32> to vector<16x32xf32>
    %c0_18 = arith.constant 0 : index
    %c0_19 = arith.constant 0 : index
    %36 = vector.load %arg7[%c0_18, %c0_19] : memref<32x32xf32, #tpu.memory_space<vmem>>, vector<32x32xf32>
    %cst_20 = arith.constant 0.000000e+00 : f32
    %37 = vector.broadcast %cst_20 : f32 to vector<16x32xf32>
    %38 = vector.extract_strided_slice %33 {offsets = [0, 0], sizes = [16, 8], strides = [1, 1]} : vector<16x32xf32> to vector<16x8xf32>
    %39 = vector.extract_strided_slice %34 {offsets = [0, 0], sizes = [16, 8], strides = [1, 1]} : vector<16x32xf32> to vector<16x8xf32>
    %40 = vector.extract_strided_slice %35 {offsets = [0, 0], sizes = [16, 8], strides = [1, 1]} : vector<16x32xf32> to vector<16x8xf32>
    "tpu.trace_start"() <{level = 10 : i32, message = "qd,kd->qk"}> : () -> ()
    %cst_21 = arith.constant dense<0.000000e+00> : vector<16x16xf32>
    %41 = tpu.matmul %38, %39, %cst_21 {dimension_numbers = #tpu.dot_dimension_numbers<[1], [1], [0], [0], [0, 0, 1, 0], [], []>} : vector<16x8xf32>, vector<16x8xf32>, vector<16x16xf32> -> vector<16x16xf32>
    "tpu.trace_stop"() : () -> ()
    %cst_22 = arith.constant dense<0xFF800000> : vector<16xf32>
    %42 = vector.multi_reduction <maximumf>, %41, %cst_22 [1] : vector<16x16xf32> to vector<16xf32>
    %43 = vector.shape_cast %42 : vector<16xf32> to vector<16x1xf32>
    %44 = vector.broadcast %43 : vector<16x1xf32> to vector<16x16xf32>
    %45 = arith.subf %41, %44 : vector<16x16xf32>
    %46 = math.exp %45 : vector<16x16xf32>
    %cst_23 = arith.constant dense<0.000000e+00> : vector<16xf32>
    %47 = vector.multi_reduction <add>, %46, %cst_23 [1] : vector<16x16xf32> to vector<16xf32>
    %48 = vector.shape_cast %47 : vector<16xf32> to vector<16x1xf32>
    %49 = tpu.reciprocal %48 {approx = true} : vector<16x1xf32> -> vector<16x1xf32>
    %50 = vector.broadcast %49 : vector<16x1xf32> to vector<16x16xf32>
    %51 = arith.mulf %46, %50 : vector<16x16xf32>
    "tpu.trace_start"() <{level = 10 : i32, message = "qk,kd->qd"}> : () -> ()
    %cst_24 = arith.constant dense<0.000000e+00> : vector<16x8xf32>
    %52 = tpu.matmul %51, %40, %cst_24 {dimension_numbers = #tpu.dot_dimension_numbers<[1], [0], [0], [1], [0, 0, 1, 1], [], []>} : vector<16x16xf32>, vector<16x8xf32>, vector<16x8xf32> -> vector<16x8xf32>
    "tpu.trace_stop"() : () -> ()
    %53 = vector.extract_strided_slice %36 {offsets = [0, 0], sizes = [8, 32], strides = [1, 1]} : vector<32x32xf32> to vector<8x32xf32>
    %cst_25 = arith.constant dense<0.000000e+00> : vector<16x32xf32>
    %54 = tpu.matmul %52, %53, %cst_25 {dimension_numbers = #tpu.dot_dimension_numbers<[1], [0], [0], [1], [0, 0, 1, 1], [], []>} : vector<16x8xf32>, vector<8x32xf32>, vector<16x32xf32> -> vector<16x32xf32>
    %55 = arith.addf %37, %54 : vector<16x32xf32>
    %56 = vector.extract_strided_slice %33 {offsets = [0, 8], sizes = [16, 8], strides = [1, 1]} : vector<16x32xf32> to vector<16x8xf32>
    %57 = vector.extract_strided_slice %34 {offsets = [0, 8], sizes = [16, 8], strides = [1, 1]} : vector<16x32xf32> to vector<16x8xf32>
    %58 = vector.extract_strided_slice %35 {offsets = [0, 8], sizes = [16, 8], strides = [1, 1]} : vector<16x32xf32> to vector<16x8xf32>
    "tpu.trace_start"() <{level = 10 : i32, message = "qd,kd->qk"}> : () -> ()
    %cst_26 = arith.constant dense<0.000000e+00> : vector<16x16xf32>
    %59 = tpu.matmul %56, %57, %cst_26 {dimension_numbers = #tpu.dot_dimension_numbers<[1], [1], [0], [0], [0, 0, 1, 0], [], []>} : vector<16x8xf32>, vector<16x8xf32>, vector<16x16xf32> -> vector<16x16xf32>
    "tpu.trace_stop"() : () -> ()
    %cst_27 = arith.constant dense<0xFF800000> : vector<16xf32>
    %60 = vector.multi_reduction <maximumf>, %59, %cst_27 [1] : vector<16x16xf32> to vector<16xf32>
    %61 = vector.shape_cast %60 : vector<16xf32> to vector<16x1xf32>
    %62 = vector.broadcast %61 : vector<16x1xf32> to vector<16x16xf32>
    %63 = arith.subf %59, %62 : vector<16x16xf32>
    %64 = math.exp %63 : vector<16x16xf32>
    %cst_28 = arith.constant dense<0.000000e+00> : vector<16xf32>
    %65 = vector.multi_reduction <add>, %64, %cst_28 [1] : vector<16x16xf32> to vector<16xf32>
    %66 = vector.shape_cast %65 : vector<16xf32> to vector<16x1xf32>
    %67 = tpu.reciprocal %66 {approx = true} : vector<16x1xf32> -> vector<16x1xf32>
    %68 = vector.broadcast %67 : vector<16x1xf32> to vector<16x16xf32>
    %69 = arith.mulf %64, %68 : vector<16x16xf32>
    "tpu.trace_start"() <{level = 10 : i32, message = "qk,kd->qd"}> : () -> ()
    %cst_29 = arith.constant dense<0.000000e+00> : vector<16x8xf32>
    %70 = tpu.matmul %69, %58, %cst_29 {dimension_numbers = #tpu.dot_dimension_numbers<[1], [0], [0], [1], [0, 0, 1, 1], [], []>} : vector<16x16xf32>, vector<16x8xf32>, vector<16x8xf32> -> vector<16x8xf32>
    "tpu.trace_stop"() : () -> ()
    %71 = vector.extract_strided_slice %36 {offsets = [8, 0], sizes = [8, 32], strides = [1, 1]} : vector<32x32xf32> to vector<8x32xf32>
    %cst_30 = arith.constant dense<0.000000e+00> : vector<16x32xf32>
    %72 = tpu.matmul %70, %71, %cst_30 {dimension_numbers = #tpu.dot_dimension_numbers<[1], [0], [0], [1], [0, 0, 1, 1], [], []>} : vector<16x8xf32>, vector<8x32xf32>, vector<16x32xf32> -> vector<16x32xf32>
    %73 = arith.addf %55, %72 : vector<16x32xf32>
    %74 = vector.extract_strided_slice %33 {offsets = [0, 16], sizes = [16, 8], strides = [1, 1]} : vector<16x32xf32> to vector<16x8xf32>
    %75 = vector.extract_strided_slice %34 {offsets = [0, 16], sizes = [16, 8], strides = [1, 1]} : vector<16x32xf32> to vector<16x8xf32>
    %76 = vector.extract_strided_slice %35 {offsets = [0, 16], sizes = [16, 8], strides = [1, 1]} : vector<16x32xf32> to vector<16x8xf32>
    "tpu.trace_start"() <{level = 10 : i32, message = "qd,kd->qk"}> : () -> ()
    %cst_31 = arith.constant dense<0.000000e+00> : vector<16x16xf32>
    %77 = tpu.matmul %74, %75, %cst_31 {dimension_numbers = #tpu.dot_dimension_numbers<[1], [1], [0], [0], [0, 0, 1, 0], [], []>} : vector<16x8xf32>, vector<16x8xf32>, vector<16x16xf32> -> vector<16x16xf32>
    "tpu.trace_stop"() : () -> ()
    %cst_32 = arith.constant dense<0xFF800000> : vector<16xf32>
    %78 = vector.multi_reduction <maximumf>, %77, %cst_32 [1] : vector<16x16xf32> to vector<16xf32>
    %79 = vector.shape_cast %78 : vector<16xf32> to vector<16x1xf32>
    %80 = vector.broadcast %79 : vector<16x1xf32> to vector<16x16xf32>
    %81 = arith.subf %77, %80 : vector<16x16xf32>
    %82 = math.exp %81 : vector<16x16xf32>
    %cst_33 = arith.constant dense<0.000000e+00> : vector<16xf32>
    %83 = vector.multi_reduction <add>, %82, %cst_33 [1] : vector<16x16xf32> to vector<16xf32>
    %84 = vector.shape_cast %83 : vector<16xf32> to vector<16x1xf32>
    %85 = tpu.reciprocal %84 {approx = true} : vector<16x1xf32> -> vector<16x1xf32>
    %86 = vector.broadcast %85 : vector<16x1xf32> to vector<16x16xf32>
    %87 = arith.mulf %82, %86 : vector<16x16xf32>
    "tpu.trace_start"() <{level = 10 : i32, message = "qk,kd->qd"}> : () -> ()
    %cst_34 = arith.constant dense<0.000000e+00> : vector<16x8xf32>
    %88 = tpu.matmul %87, %76, %cst_34 {dimension_numbers = #tpu.dot_dimension_numbers<[1], [0], [0], [1], [0, 0, 1, 1], [], []>} : vector<16x16xf32>, vector<16x8xf32>, vector<16x8xf32> -> vector<16x8xf32>
    "tpu.trace_stop"() : () -> ()
    %89 = vector.extract_strided_slice %36 {offsets = [16, 0], sizes = [8, 32], strides = [1, 1]} : vector<32x32xf32> to vector<8x32xf32>
    %cst_35 = arith.constant dense<0.000000e+00> : vector<16x32xf32>
    %90 = tpu.matmul %88, %89, %cst_35 {dimension_numbers = #tpu.dot_dimension_numbers<[1], [0], [0], [1], [0, 0, 1, 1], [], []>} : vector<16x8xf32>, vector<8x32xf32>, vector<16x32xf32> -> vector<16x32xf32>
    %91 = arith.addf %73, %90 : vector<16x32xf32>
    %92 = vector.extract_strided_slice %33 {offsets = [0, 24], sizes = [16, 8], strides = [1, 1]} : vector<16x32xf32> to vector<16x8xf32>
    %93 = vector.extract_strided_slice %34 {offsets = [0, 24], sizes = [16, 8], strides = [1, 1]} : vector<16x32xf32> to vector<16x8xf32>
    %94 = vector.extract_strided_slice %35 {offsets = [0, 24], sizes = [16, 8], strides = [1, 1]} : vector<16x32xf32> to vector<16x8xf32>
    "tpu.trace_start"() <{level = 10 : i32, message = "qd,kd->qk"}> : () -> ()
    %cst_36 = arith.constant dense<0.000000e+00> : vector<16x16xf32>
    %95 = tpu.matmul %92, %93, %cst_36 {dimension_numbers = #tpu.dot_dimension_numbers<[1], [1], [0], [0], [0, 0, 1, 0], [], []>} : vector<16x8xf32>, vector<16x8xf32>, vector<16x16xf32> -> vector<16x16xf32>
    "tpu.trace_stop"() : () -> ()
    %cst_37 = arith.constant dense<0xFF800000> : vector<16xf32>
    %96 = vector.multi_reduction <maximumf>, %95, %cst_37 [1] : vector<16x16xf32> to vector<16xf32>
    %97 = vector.shape_cast %96 : vector<16xf32> to vector<16x1xf32>
    %98 = vector.broadcast %97 : vector<16x1xf32> to vector<16x16xf32>
    %99 = arith.subf %95, %98 : vector<16x16xf32>
    %100 = math.exp %99 : vector<16x16xf32>
    %cst_38 = arith.constant dense<0.000000e+00> : vector<16xf32>
    %101 = vector.multi_reduction <add>, %100, %cst_38 [1] : vector<16x16xf32> to vector<16xf32>
    %102 = vector.shape_cast %101 : vector<16xf32> to vector<16x1xf32>
    %103 = tpu.reciprocal %102 {approx = true} : vector<16x1xf32> -> vector<16x1xf32>
    %104 = vector.broadcast %103 : vector<16x1xf32> to vector<16x16xf32>
    %105 = arith.mulf %100, %104 : vector<16x16xf32>
    "tpu.trace_start"() <{level = 10 : i32, message = "qk,kd->qd"}> : () -> ()
    %cst_39 = arith.constant dense<0.000000e+00> : vector<16x8xf32>
    %106 = tpu.matmul %105, %94, %cst_39 {dimension_numbers = #tpu.dot_dimension_numbers<[1], [0], [0], [1], [0, 0, 1, 1], [], []>} : vector<16x16xf32>, vector<16x8xf32>, vector<16x8xf32> -> vector<16x8xf32>
    "tpu.trace_stop"() : () -> ()
    %107 = vector.extract_strided_slice %36 {offsets = [24, 0], sizes = [8, 32], strides = [1, 1]} : vector<32x32xf32> to vector<8x32xf32>
    %cst_40 = arith.constant dense<0.000000e+00> : vector<16x32xf32>
    %108 = tpu.matmul %106, %107, %cst_40 {dimension_numbers = #tpu.dot_dimension_numbers<[1], [0], [0], [1], [0, 0, 1, 1], [], []>} : vector<16x8xf32>, vector<8x32xf32>, vector<16x32xf32> -> vector<16x32xf32>
    %109 = arith.addf %91, %108 : vector<16x32xf32>
    %110 = arith.addf %3, %109 : vector<16x32xf32>
    %c0_41 = arith.constant 0 : index
    %c0_42 = arith.constant 0 : index
    %111 = vector.load %arg8[%c0_41, %c0_42] : memref<1x32xf32, #tpu.memory_space<vmem>>, vector<1x32xf32>
    %112 = vector.broadcast %111 : vector<1x32xf32> to vector<16x32xf32>
    %113 = arith.addf %110, %112 : vector<16x32xf32>
    %cst_43 = arith.constant dense<0.000000e+00> : vector<16xf32>
    %114 = vector.multi_reduction <add>, %113, %cst_43 [1] : vector<16x32xf32> to vector<16xf32>
    %115 = vector.shape_cast %114 : vector<16xf32> to vector<16x1xf32>
    %cst_44 = arith.constant 3.200000e+01 : f32
    %116 = vector.broadcast %cst_44 : f32 to vector<16x1xf32>
    %117 = arith.divf %115, %116 : vector<16x1xf32>
    %118 = vector.broadcast %117 : vector<16x1xf32> to vector<16x32xf32>
    %119 = arith.subf %113, %118 : vector<16x32xf32>
    %120 = arith.mulf %119, %119 : vector<16x32xf32>
    %cst_45 = arith.constant dense<0.000000e+00> : vector<16xf32>
    %121 = vector.multi_reduction <add>, %120, %cst_45 [1] : vector<16x32xf32> to vector<16xf32>
    %122 = vector.shape_cast %121 : vector<16xf32> to vector<16x1xf32>
    %cst_46 = arith.constant 3.200000e+01 : f32
    %123 = vector.broadcast %cst_46 : f32 to vector<16x1xf32>
    %124 = arith.divf %122, %123 : vector<16x1xf32>
    %cst_47 = arith.constant 9.99999997E-7 : f32
    %125 = vector.broadcast %cst_47 : f32 to vector<16x1xf32>
    %126 = arith.addf %124, %125 : vector<16x1xf32>
    %127 = math.rsqrt %126 : vector<16x1xf32>
    %128 = vector.broadcast %127 : vector<16x1xf32> to vector<16x32xf32>
    %129 = arith.mulf %119, %128 : vector<16x32xf32>
    %c0_48 = arith.constant 0 : index
    %c0_49 = arith.constant 0 : index
    %130 = vector.load %arg9[%c0_48, %c0_49] : memref<1x32xf32, #tpu.memory_space<vmem>>, vector<1x32xf32>
    %131 = vector.broadcast %130 : vector<1x32xf32> to vector<16x32xf32>
    %132 = arith.mulf %129, %131 : vector<16x32xf32>
    %c0_50 = arith.constant 0 : index
    %c0_51 = arith.constant 0 : index
    %133 = vector.load %arg10[%c0_50, %c0_51] : memref<1x32xf32, #tpu.memory_space<vmem>>, vector<1x32xf32>
    %134 = vector.broadcast %133 : vector<1x32xf32> to vector<16x32xf32>
    %135 = arith.addf %132, %134 : vector<16x32xf32>
    %c0_52 = arith.constant 0 : index
    %c0_53 = arith.constant 0 : index
    %136 = vector.load %arg11[%c0_52, %c0_53] : memref<32x128xf32, #tpu.memory_space<vmem>>, vector<32x128xf32>
    %cst_54 = arith.constant dense<0.000000e+00> : vector<16x128xf32>
    %137 = tpu.matmul %135, %136, %cst_54 {dimension_numbers = #tpu.dot_dimension_numbers<[1], [0], [0], [1], [0, 0, 1, 1], [], []>} : vector<16x32xf32>, vector<32x128xf32>, vector<16x128xf32> -> vector<16x128xf32>
    %c0_55 = arith.constant 0 : index
    %c0_56 = arith.constant 0 : index
    %138 = vector.load %arg12[%c0_55, %c0_56] : memref<1x128xf32, #tpu.memory_space<vmem>>, vector<1x128xf32>
    %139 = vector.broadcast %138 : vector<1x128xf32> to vector<16x128xf32>
    %140 = arith.addf %137, %139 : vector<16x128xf32>
    %cst_57 = arith.constant 5.000000e-01 : f32
    %141 = vector.broadcast %cst_57 : f32 to vector<16x128xf32>
    %142 = arith.mulf %141, %140 : vector<16x128xf32>
    %cst_58 = arith.constant 0.707106769 : f32
    %143 = vector.broadcast %cst_58 : f32 to vector<16x128xf32>
    %144 = arith.mulf %140, %143 : vector<16x128xf32>
    %145 = math.erf %144 : vector<16x128xf32>
    %cst_59 = arith.constant 1.000000e+00 : f32
    %146 = vector.broadcast %cst_59 : f32 to vector<16x128xf32>
    %147 = arith.addf %146, %145 : vector<16x128xf32>
    %148 = arith.mulf %142, %147 : vector<16x128xf32>
    %c0_60 = arith.constant 0 : index
    %c0_61 = arith.constant 0 : index
    %149 = vector.load %arg13[%c0_60, %c0_61] : memref<128x32xf32, #tpu.memory_space<vmem>>, vector<128x32xf32>
    %cst_62 = arith.constant dense<0.000000e+00> : vector<16x32xf32>
    %150 = tpu.matmul %148, %149, %cst_62 {dimension_numbers = #tpu.dot_dimension_numbers<[1], [0], [0], [1], [0, 0, 1, 1], [], []>} : vector<16x128xf32>, vector<128x32xf32>, vector<16x32xf32> -> vector<16x32xf32>
    %c0_63 = arith.constant 0 : index
    %c0_64 = arith.constant 0 : index
    %151 = vector.load %arg14[%c0_63, %c0_64] : memref<1x32xf32, #tpu.memory_space<vmem>>, vector<1x32xf32>
    %152 = vector.broadcast %151 : vector<1x32xf32> to vector<16x32xf32>
    %153 = arith.addf %150, %152 : vector<16x32xf32>
    %154 = arith.addf %113, %153 : vector<16x32xf32>
    %cst_65 = arith.constant dense<0.000000e+00> : vector<16xf32>
    %155 = vector.multi_reduction <add>, %154, %cst_65 [1] : vector<16x32xf32> to vector<16xf32>
    %156 = vector.shape_cast %155 : vector<16xf32> to vector<16x1xf32>
    %cst_66 = arith.constant 3.200000e+01 : f32
    %157 = vector.broadcast %cst_66 : f32 to vector<16x1xf32>
    %158 = arith.divf %156, %157 : vector<16x1xf32>
    %159 = vector.broadcast %158 : vector<16x1xf32> to vector<16x32xf32>
    %160 = arith.subf %154, %159 : vector<16x32xf32>
    %161 = arith.mulf %160, %160 : vector<16x32xf32>
    %cst_67 = arith.constant dense<0.000000e+00> : vector<16xf32>
    %162 = vector.multi_reduction <add>, %161, %cst_67 [1] : vector<16x32xf32> to vector<16xf32>
    %163 = vector.shape_cast %162 : vector<16xf32> to vector<16x1xf32>
    %cst_68 = arith.constant 3.200000e+01 : f32
    %164 = vector.broadcast %cst_68 : f32 to vector<16x1xf32>
    %165 = arith.divf %163, %164 : vector<16x1xf32>
    %cst_69 = arith.constant 9.99999997E-7 : f32
    %166 = vector.broadcast %cst_69 : f32 to vector<16x1xf32>
    %167 = arith.addf %165, %166 : vector<16x1xf32>
    %168 = math.rsqrt %167 : vector<16x1xf32>
    %169 = vector.broadcast %168 : vector<16x1xf32> to vector<16x32xf32>
    %170 = arith.mulf %160, %169 : vector<16x32xf32>
    %c0_70 = arith.constant 0 : index
    %c0_71 = arith.constant 0 : index
    %171 = vector.load %arg15[%c0_70, %c0_71] : memref<1x32xf32, #tpu.memory_space<vmem>>, vector<1x32xf32>
    %172 = vector.broadcast %171 : vector<1x32xf32> to vector<16x32xf32>
    %173 = arith.mulf %170, %172 : vector<16x32xf32>
    %c0_72 = arith.constant 0 : index
    %c0_73 = arith.constant 0 : index
    %174 = vector.load %arg16[%c0_72, %c0_73] : memref<1x32xf32, #tpu.memory_space<vmem>>, vector<1x32xf32>
    %175 = vector.broadcast %174 : vector<1x32xf32> to vector<16x32xf32>
    %176 = arith.addf %173, %175 : vector<16x32xf32>
    %c0_74 = arith.constant 0 : index
    %c0_75 = arith.constant 0 : index
    %c0_76 = arith.constant 0 : index
    %177 = vector.load %arg17[%c0_74, %c0_75, %c0_76] : memref<1x16x32xf32, #tpu.memory_space<vmem>>, vector<1x16x32xf32>
    %178 = vector.shape_cast %177 : vector<1x16x32xf32> to vector<16x32xf32>
    %179 = vector.shape_cast %176 : vector<16x32xf32> to vector<1x16x32xf32>
    tpu.vector_store %arg17[%c0_74, %c0_75, %c0_76], %179 {strides = array<i32>} : memref<1x16x32xf32, #tpu.memory_space<vmem>>, vector<1x16x32xf32>,
    return
  }
  func.func @transform_0(%arg0: i32) -> (i32, i32, i32) {
    %c0_i32 = arith.constant 0 : i32
    %c0_i32_0 = arith.constant 0 : i32
    %c0_i32_1 = arith.constant 0 : i32
    return %arg0, %c0_i32, %c0_i32_0 : i32, i32, i32
  }
  func.func @transform_1(%arg0: i32) -> (i32, i32) {
    %c0_i32 = arith.constant 0 : i32
    %c0_i32_0 = arith.constant 0 : i32
    %c0_i32_1 = arith.constant 0 : i32
    return %c0_i32, %c0_i32_0 : i32, i32
  }
  func.func @transform_2(%arg0: i32) -> (i32, i32) {
    %c0_i32 = arith.constant 0 : i32
    %c0_i32_0 = arith.constant 0 : i32
    %c0_i32_1 = arith.constant 0 : i32
    return %c0_i32, %c0_i32_0 : i32, i32
  }
  func.func @transform_3(%arg0: i32) -> (i32, i32) {
    %c0_i32 = arith.constant 0 : i32
    %c0_i32_0 = arith.constant 0 : i32
    %c0_i32_1 = arith.constant 0 : i32
    return %c0_i32, %c0_i32_0 : i32, i32
  }
  func.func @transform_4(%arg0: i32) -> (i32, i32) {
    %c0_i32 = arith.constant 0 : i32
    %c0_i32_0 = arith.constant 0 : i32
    %c0_i32_1 = arith.constant 0 : i32
    return %c0_i32, %c0_i32_0 : i32, i32
  }
  func.func @transform_5(%arg0: i32) -> (i32, i32) {
    %c0_i32 = arith.constant 0 : i32
    %c0_i32_0 = arith.constant 0 : i32
    %c0_i32_1 = arith.constant 0 : i32
    return %c0_i32, %c0_i32_0 : i32, i32
  }
  func.func @transform_6(%arg0: i32) -> (i32, i32) {
    %c0_i32 = arith.constant 0 : i32
    %c0_i32_0 = arith.constant 0 : i32
    %c0_i32_1 = arith.constant 0 : i32
    return %c0_i32, %c0_i32_0 : i32, i32
  }
  func.func @transform_7(%arg0: i32) -> (i32, i32) {
    %c0_i32 = arith.constant 0 : i32
    %c0_i32_0 = arith.constant 0 : i32
    %c0_i32_1 = arith.constant 0 : i32
    return %c0_i32, %c0_i32_0 : i32, i32
  }
  func.func @transform_8(%arg0: i32) -> (i32, i32) {
    %c0_i32 = arith.constant 0 : i32
    %c0_i32_0 = arith.constant 0 : i32
    %c0_i32_1 = arith.constant 0 : i32
    return %c0_i32, %c0_i32_0 : i32, i32
  }
  func.func @transform_9(%arg0: i32) -> (i32, i32) {
    %c0_i32 = arith.constant 0 : i32
    %c0_i32_0 = arith.constant 0 : i32
    %c0_i32_1 = arith.constant 0 : i32
    return %c0_i32, %c0_i32_0 : i32, i32
  }
  func.func @transform_10(%arg0: i32) -> (i32, i32) {
    %c0_i32 = arith.constant 0 : i32
    %c0_i32_0 = arith.constant 0 : i32
    %c0_i32_1 = arith.constant 0 : i32
    return %c0_i32, %c0_i32_0 : i32, i32
  }
  func.func @transform_11(%arg0: i32) -> (i32, i32) {
    %c0_i32 = arith.constant 0 : i32
    %c0_i32_0 = arith.constant 0 : i32
    %c0_i32_1 = arith.constant 0 : i32
    return %c0_i32, %c0_i32_0 : i32, i32
  }
  func.func @transform_12(%arg0: i32) -> (i32, i32) {
    %c0_i32 = arith.constant 0 : i32
    %c0_i32_0 = arith.constant 0 : i32
    %c0_i32_1 = arith.constant 0 : i32
    return %c0_i32, %c0_i32_0 : i32, i32
  }
  func.func @transform_13(%arg0: i32) -> (i32, i32) {
    %c0_i32 = arith.constant 0 : i32
    %c0_i32_0 = arith.constant 0 : i32
    %c0_i32_1 = arith.constant 0 : i32
    return %c0_i32, %c0_i32_0 : i32, i32
  }
  func.func @transform_14(%arg0: i32) -> (i32, i32) {
    %c0_i32 = arith.constant 0 : i32
    %c0_i32_0 = arith.constant 0 : i32
    %c0_i32_1 = arith.constant 0 : i32
    return %c0_i32, %c0_i32_0 : i32, i32
  }
  func.func @transform_15(%arg0: i32) -> (i32, i32) {
    %c0_i32 = arith.constant 0 : i32
    %c0_i32_0 = arith.constant 0 : i32
    %c0_i32_1 = arith.constant 0 : i32
    return %c0_i32, %c0_i32_0 : i32, i32
  }
  func.func @transform_16(%arg0: i32) -> (i32, i32, i32) {
    %c0_i32 = arith.constant 0 : i32
    %c0_i32_0 = arith.constant 0 : i32
    %c0_i32_1 = arith.constant 0 : i32
    return %arg0, %c0_i32, %c0_i32_0 : i32, i32, i32
  }
}

</mosaic_0001>

<bundles_post_ra>
// kernel: tte_forward_pallas.1
= control target key start
LH: loop header
LB: loop body
LE: loop exit
PB: predicated region body
PF: predicated region fallthrough
CT: control target
= control target key end

     0   :  { %s1744_s21 = smov 0   ;;  %s2022_s0 = inlined_call_operand.vmem [shape: f32[16,16,32], index: 0, kind: input, shape index: {}]   ;;  %s2023_s1 = inlined_call_operand.vmem [shape: f32[16,32], index: 1, kind: input, shape index: {}]   ;;  %s2024_s2 = inlined_call_operand.vmem [shape: f32[1,32], index: 2, kind: input, shape index: {}]   ;;  %s2025_s3 = inlined_call_operand.vmem [shape: f32[1,32], index: 3, kind: input, shape index: {}]   ;;  %s2026_s4 = inlined_call_operand.vmem [shape: f32[32,96], index: 4, kind: input, shape index: {}]   ;;  %s2027_s5 = inlined_call_operand.vmem [shape: f32[1,96], index: 5, kind: input, shape index: {}]   ;;  %s2028_s6 = inlined_call_operand.vmem [shape: f32[32,32], index: 6, kind: input, shape index: {}]   ;;  %s2029_s7 = inlined_call_operand.vmem [shape: f32[1,32], index: 7, kind: input, shape index: {}]   ;;  %s2030_s8 = inlined_call_operand.vmem [shape: f32[1,32], index: 8, kind: input, shape index: {}]   ;;  %s2031_s9 = inlined_call_operand.vmem [shape: f32[1,32], index: 9, kind: input, shape index: {}]   ;;  %s2032_s10 = inlined_call_operand.vmem [shape: f32[32,128], index: 10, kind: input, shape index: {}]   ;;  %s2033_s11 = inlined_call_operand.vmem [shape: f32[1,128], index: 11, kind: input, shape index: {}]   ;;  %s2034_s12 = inlined_call_operand.vmem [shape: f32[128,32], index: 12, kind: input, shape index: {}]   ;;  %s2035_s13 = inlined_call_operand.vmem [shape: f32[1,32], index: 13, kind: input, shape index: {}]   ;;  %s2036_s14 = inlined_call_operand.vmem [shape: f32[1,32], index: 14, kind: input, shape index: {}]   ;;  %s2037_s15 = inlined_call_operand.vmem [shape: f32[1,32], index: 15, kind: input, shape index: {}]   ;;  %s2038_s16 = inlined_call_operand.vmem [shape: f32[16,16,32], index: 16, kind: output, shape index: {}]  }
   0x1   :  { %2039 = sst [smem:[#allocation2_spill]] %s2022_s0 }
   0x2 LB: > { %s1488_s22 = sadd.s32 4294967295, %s1645_s21   ;;  %p1492_p0 = scmp.ge.s32.totalorder %s1645_s21, 1  ;;  %s1645_s21 = sphi %s1744_s21, %s26_s21  }
   0x3   : > { %p462_p1 = scmp.lt.s32.totalorder %s1645_s21, 17 }
   0x5   : > { %p463_p2 = pnand %p1492_p0, %p462_p1 }
   0x6   : > { %p512_p3 = scmp.lt.s32.totalorder (!%p463_p2), %s1488_s22, 15  ;;  %s2040_s28 = sld [smem:[#allocation2_spill]] (!%p463_p2) }
   0x7   : > { %466 = sbr.rel (%p463_p2) target bundleno = 2577 (0xa11), region = 84  ;;  %s1648_s19 = smov (!%p463_p2), 96  }
   0x8   : > { %s1649_s20 = smov (!%p463_p2), 64   ;;  %s1650_s24 = smov (!%p463_p2), 88  }
   0x9   : > { %s1651_s25 = smov (!%p463_p2), 120   ;;  %s1652_s26 = smov (!%p463_p2), 72  }
   0xa   : > { %s1653_s27 = smov (!%p463_p2), 104   ;;  %s1654_s30 = smov (!%p463_p2), 80  }
   0xb   : > { %s1655_s0 = smov (!%p463_p2), 112   ;;  %s1656_s17 = smov (!%p463_p2), 56  }
   0xc   : > { %s2042_s22 = smov (!%p512_p3, %s1488_s22), 15  ;;  %v524_v0 = vld [vmem:[%s2023_s1] sm:$0xff]  ;;  %vm528_vm0 = vcmask 261120   ;;  %v525_v4 = vld [vmem:[%s2023_s1 + $0x8] sm:$0xff]  ;;  %v1647_v8 = vmov 32.0   ;;  %v595_v25 = vld [vmem:[%s2026_s4 + $0x18] sm:$0xff] }
   0xd   : > { %s1537_s23 = sshll.u32 %s2042_s22, 4  ;;  %1589 = vrcp.f32 %v1647_v8  ;;  %618 = vmatpush.msra.mxu0 %v595_v25  ;;  %v594_v26 = vld [vmem:[%s2026_s4 + $0x10] sm:$0xff]  ;;  %v593_v27 = vld [vmem:[%s2026_s4 + $0x8] sm:$0xff]  ;;  %v592_v28 = vld [vmem:[%s2026_s4] sm:$0xff]  ;;  %vm641_vm8 = vcmask 64512   ;;  %vm675_vm9 = vcmask 130048  }
   0xe   : > { %s516_s29 = scalar_lea.vmem %s2040_s28, %s1537_s23  ;;  %v1579_v43 = vld [vmem:[%s2024_s2] ss:$0 sm:$0xff]  ;;  %s1657_s18 = smov 48  }
   0xf   : > { %v522_v1 = vld [vmem:[%s516_s29] sm:$0xff]  ;;  %v523_v3 = vld [vmem:[%s516_s29 + $0x8] sm:$0xff]  ;;  %619 = vmatpush.msra.mxu0 %v594_v26 }
  0x10   : > { %v1763_v2 = vadd.f32 %v524_v0, %v522_v1  ;;  %v1770_v6 = vadd.f32 %v525_v4, %v523_v3  ;;  %v1580_v47 = vld [vmem:[%s2025_s3] ss:$0 sm:$0xff] }
  0x11   : > { %620 = vmatpush.msra.mxu0 %v593_v27  ;;  %v1581_v58 = vld [vmem:[%s2027_s5] ss:$0 sm:$0xff] }
  0x12   : > { %v529_v5 = vsel %vm528_vm0, %v1763_v2, 0.0  ;;  %v532_v7 = vsel %vm528_vm0, %v1770_v6, 0.0 }
  0x13   : > { %530 = vadd.xlane.f32.xlu0 %v529_v5  ;;  %v1590_v9 = vpop.eup %1589  ;;  %621 = vmatpush.msra.mxu0 %v592_v28 }
  0x14   : > { %v536_v10 = vmul.f32 32.0, %v1590_v9  ;;  %vm540_vm1 = vweird.f32 %v1590_v9 }
  0x16   : > { %v537_v11 = vsub.f32 1.0, %v536_v10 }
  0x18   : > { %v538_v12 = vmul.f32 %v1590_v9, %v537_v11 }
  0x1a   : > { %v539_v13 = vadd.f32 %v1590_v9, %v538_v12  ;;  %v631_v12 = vld [vmem:[%s2028_s6] sm:$0xff] }
  0x1b   : > { %533 = vadd.xlane.f32.xlu0 %v532_v7  ;;  %879 = vmatpush.msra.mxu1 %v631_v12 }
  0x1c   : > { %v1774_v14 = vsel %vm540_vm1, %v1590_v9, %v539_v13 }
  0x86   : > { %v531_v15 = vpop.xlane.xlu0 %530 }
  0x87   : > { %v542_v16 = vmul.f32 %v1774_v14, %v531_v15 }
  0x89   : > { %v544_v17 = vsub.f32 %v1763_v2, %v542_v16 }
  0x8b   : > { %v546_v18 = vmul.f32 %v544_v17, %v544_v17 }
  0x8d   : > { %v548_v19 = vsel %vm528_vm0, %v546_v18, 0.0 }
  0x8e   : > { %549 = vadd.xlane.f32.xlu1 %v548_v19  ;;  %v534_v20 = vpop.xlane.xlu0 %533 }
  0x8f   : > { %v543_v21 = vmul.f32 %v1774_v14, %v534_v20 }
  0x91   : > { %v545_v22 = vsub.f32 %v1770_v6, %v543_v21 }
  0x93   : > { %v547_v23 = vmul.f32 %v545_v22, %v545_v22 }
  0x95   : > { %v551_v24 = vsel %vm528_vm0, %v547_v23, 0.0 }
  0x96   : > { %552 = vadd.xlane.f32.xlu1 %v551_v24 }
 0x101   : > { %v550_v29 = vpop.xlane.xlu1 %549 }
 0x102   : > { %v554_v30 = vmul.f32 %v550_v29, %v1774_v14 }
 0x104   : > { %v556_v31 = vadd.f32 1e-06, %v554_v30 }
 0x106   : > { %1591 = vrsqrt.f32 %v556_v31  ;;  %vm564_vm3 = vweird.f32 %v556_v31 }
 0x109   : > { %v553_v32 = vpop.xlane.xlu1 %552 }
 0x10a   : > { %v555_v33 = vmul.f32 %v553_v32, %v1774_v14 }
 0x10c   : > { %v1592_v34 = vpop.eup %1591  ;;  %v557_v35 = vadd.f32 1e-06, %v555_v33 }
 0x10d   : > { %v559_v36 = vmul.f32 %v1592_v34, %v556_v31  ;;  %vm565_vm2 = vweird.f32 %v1592_v34 }
 0x10e   : > { %1593 = vrsqrt.f32 %v557_v35  ;;  %vm566_vm4 = vmor %vm564_vm3, %vm565_vm2  ;;  %vm574_vm6 = vweird.f32 %v557_v35 }
 0x10f   : > { %v560_v37 = vmul.f32 %v1592_v34, %v559_v36 }
 0x111   : > { %v561_v38 = vmul.f32 0.5, %v560_v37 }
 0x113   : > { %v562_v39 = vsub.f32 1.5, %v561_v38 }
 0x114   : > { %v1594_v40 = vpop.eup %1593 }
 0x115   : > { %v563_v41 = vmul.f32 %v1592_v34, %v562_v39  ;;  %v569_v42 = vmul.f32 %v1594_v40, %v557_v35  ;;  %vm575_vm5 = vweird.f32 %v1594_v40 }
 0x116   : > { %vm576_vm7 = vmor %vm574_vm6, %vm575_vm5 }
 0x117   : > { %v567_v44 = vsel %vm566_vm4, %v1592_v34, %v563_v41  ;;  %v570_v45 = vmul.f32 %v1594_v40, %v569_v42 }
 0x118   : > { %v578_v46 = vmul.f32 %v567_v44, %v544_v17 }
 0x119   : > { %v571_v48 = vmul.f32 0.5, %v570_v45 }
 0x11a   : > { %v584_v49 = vmul.f32 %v1579_v43, %v578_v46 }
 0x11b   : > { %v572_v50 = vsub.f32 1.5, %v571_v48 }
 0x11c   : > { %v590_v51 = vadd.f32 %v1580_v47, %v584_v49 }
 0x11d   : > { %v573_v52 = vmul.f32 %v1594_v40, %v572_v50 }
 0x11e   : > { %1497 = vmatmul.msk.f32.vlgmr.msra.gmra.mxu0 %vm528_vm0, %v590_v51 }
 0x11f   : > { %v577_v53 = vsel %vm576_vm7, %v1594_v40, %v573_v52 }
 0x120   : > { %v579_v54 = vmul.f32 %v577_v53, %v545_v22 }
 0x122   : > { %v585_v55 = vmul.f32 %v1579_v43, %v579_v54 }
 0x124   : > { %v591_v56 = vadd.f32 %v1580_v47, %v585_v55 }
 0x126   : > { %1498 = vmatmul.msk.f32.gmra.mxu0 %vm528_vm0, %v591_v56 }
 0x19b   : > { %v623_v57 = vpop.f32.mrf.mxu0 }
 0x19c   : > { %v624_v61 = vadd.f32 %v1581_v58, %v623_v57 }
 0x19e   : > { %v629_v0 = vmul.f32 0.35355338, %v624_v61 }
 0x1a3   : > { %v626_v59 = vpop.f32.mrf.mxu0 }
 0x1a4   : > { %v627_v60 = vadd.f32 %v1581_v58, %v626_v59 }
 0x1a6   : > { %639 = vrot.lane.b32.xlu2 %v627_v60, %s1648_s19  ;;  %v630_v1 = vmul.f32 0.35355338, %v627_v60  ;;  %v1813_v8 = vpack.i.bf16 %v624_v61, %v627_v60 }
 0x1ae   : > { %637 = vrot.lane.b32.xlu2 %v624_v61, %s1648_s19  ;;  %s1658_s19 = smov 40  }
 0x200   : > { %v640_v62 = vpop.permute.xlu2 %639 }
 0x201   : > { %1499 = vmatpush.xpose.msk.msra.mxu3 %vm641_vm8, %v640_v62 }
 0x208   : > { %v638_v63 = vpop.permute.xlu2 %637 }
 0x209   : > { %1500 = vmatpush.xpose.msk.msra.mxu3 %vm641_vm8, %v638_v63 }
 0x20c   : > { %1501 = vmatmul.msk.f32.vlgmr.msra.gmra.mxu3 %vm641_vm8, %v629_v0 }
 0x214   : > { %1502 = vmatmul.msk.f32.gmra.mxu3 %vm641_vm8, %v630_v1 }
 0x28f   : > { %v669_v3 = vpop.f32.mrf.mxu3 }
 0x290   : > { %v676_v4 = vsel %vm675_vm9, %v669_v3, -inf }
 0x291   : > { %677 = vmax.xlane.f32.xlu0 %v676_v4 }
 0x297   : > { %v672_v5 = vpop.f32.mrf.mxu3 }
 0x298   : > { %v679_v7 = vsel %vm675_vm9, %v672_v5, -inf }
 0x299   : > { %680 = vmax.xlane.f32.xlu1 %v679_v7 }
 0x2a5   : > { %1560 = vrot.lane.b32.xlu0 %v1813_v8, %s1649_s20 }
 0x2ad   : > { %737 = vrot.lane.b32.xlu0 %v624_v61, %s1650_s24 }
 0x2b5   : > { %733 = vrot.lane.b32.xlu0 %v629_v0, %s1651_s25 }
 0x2bd   : > { %1020 = vrot.lane.b32.xlu0 %v627_v60, %s1652_s26 }
 0x2c5   : > { %1018 = vrot.lane.b32.xlu0 %v624_v61, %s1652_s26 }
 0x2cd   : > { %1014 = vrot.lane.b32.xlu0 %v629_v0, %s1653_s27 }
 0x304   : > { %v678_v9 = vpop.xlane.xlu0 %677 }
 0x305   : > { %v682_v10 = vsub.f32 %v669_v3, %v678_v9 }
 0x307   : > { %v684_v11 = vmul.f32 1.442695, %v682_v10 }
 0x309   : > { %1595 = vpow2.f32 %v684_v11 }
 0x30c   : > { %v681_v13 = vpop.xlane.xlu1 %680 }
 0x30d   : > { %v683_v15 = vsub.f32 %v672_v5, %v681_v13 }
 0x30f   : > { %v1596_v16 = vpop.eup %1595  ;;  %v686_v17 = vmul.f32 1.442695, %v683_v15 }
 0x310   : > { %v688_v18 = vsel %vm675_vm9, %v1596_v16, 0.0 }
 0x311   : > { %1597 = vpow2.f32 %v686_v17  ;;  %689 = vadd.xlane.f32.xlu2 %v688_v18 }
 0x317   : > { %v1598_v19 = vpop.eup %1597  ;;  %v1561_v20 = vpop.permute.xlu0 %1560 }
 0x318   : > { %v691_v21 = vsel %vm675_vm9, %v1598_v19, 0.0  ;;  %v1562_v22 = vunpack.i.l.bf16 %v1561_v20  ;;  %v1563_v23 = vunpack.i.h.bf16 %v1561_v20 }
 0x319   : > { %692 = vadd.xlane.f32.xlu1 %v691_v21 }
 0x31a   : > { %724 = vmatpush.msra.mxu2 %v1562_v22 }
 0x31c   : > { %725 = vmatpush.msra.mxu2 %v1563_v23 }
 0x31f   : > { %v738_v24 = vpop.permute.xlu0 %737 }
 0x327   : > { %v734_v25 = vpop.permute.xlu0 %733 }
 0x329   : > { %893 = vrot.lane.b32.xlu2 %v627_v60, %s1654_s30 }
 0x32f   : > { %v1021_v26 = vpop.permute.xlu0 %1020 }
 0x330   : > { %1523 = vmatpush.xpose.msk.msrb.mxu1 %vm641_vm8, %v1021_v26 }
 0x331   : > { %1016 = vrot.lane.b32.xlu2 %v630_v1, %s1653_s27 }
 0x332   : > { %739 = vrot.lane.b32.xlu1 %v627_v60, %s1650_s24 }
 0x337   : > { %v1019_v27 = vpop.permute.xlu0 %1018 }
 0x338   : > { %1524 = vmatpush.xpose.msk.msrb.mxu1 %vm641_vm8, %v1019_v27 }
 0x33a   : > { %735 = vrot.lane.b32.xlu1 %v630_v1, %s1651_s25  ;;  %s521_s25 = scalar_lea.vmem %s2038_s16, %s1537_s23 }
 0x33f   : > { %v1015_v42 = vpop.permute.xlu0 %1014 }
 0x342   : > { %891 = vrot.lane.b32.xlu1 %v624_v61, %s1654_s30 }
 0x34a   : > { %887 = vrot.lane.b32.xlu1 %v629_v0, %s1655_s0 }
 0x352   : > { %889 = vrot.lane.b32.xlu1 %v630_v1, %s1655_s0 }
 0x384   : > { %v690_v28 = vpop.xlane.xlu2 %689 }
 0x385   : > { %1599 = vrcp.f32 %v690_v28 }
 0x38b   : > { %v1600_v29 = vpop.eup %1599 }
 0x38c   : > { %v693_v30 = vpop.xlane.xlu1 %692  ;;  %v696_v31 = vmul.f32 %v1600_v29, %v1596_v16  ;;  %v894_v35 = vpop.permute.xlu2 %893 }
 0x38d   : > { %1601 = vrcp.f32 %v693_v30 }
 0x38e   : > { %1503 = vmatmul.msk.f32.vlgmr.msra.gmra.mxu2 %vm675_vm9, %v696_v31 }
 0x393   : > { %v1602_v32 = vpop.eup %1601 }
 0x394   : > { %v697_v33 = vmul.f32 %v1602_v32, %v1598_v19  ;;  %v1017_v43 = vpop.permute.xlu2 %1016 }
 0x396   : > { %1504 = vmatmul.msk.f32.gmra.mxu2 %vm675_vm9, %v697_v33 }
 0x3a4   : > { %v740_v34 = vpop.permute.xlu1 %739 }
 0x3a5   : > { %1505 = vmatpush.xpose.msk.msrb.mxu3 %vm641_vm8, %v740_v34 }
 0x3a9   : > { %1506 = vmatpush.xpose.msk.msrb.mxu3 %vm641_vm8, %v738_v24 }
 0x3ac   : > { %1507 = vmatmul.msk.f32.vlgmr.msrb.gmra.mxu3 %vm641_vm8, %v734_v25  ;;  %v736_v36 = vpop.permute.xlu1 %735 }
 0x3ad   : > { %1515 = vmatpush.xpose.msk.msra.mxu3 %vm641_vm8, %v894_v35 }
 0x3b4   : > { %1508 = vmatmul.msk.f32.gmra.mxu3 %vm641_vm8, %v736_v36  ;;  %v892_v37 = vpop.permute.xlu1 %891 }
 0x3b5   : > { %1516 = vmatpush.xpose.msk.msra.mxu3 %vm641_vm8, %v892_v37 }
 0x3bc   : > { %v888_v38 = vpop.permute.xlu1 %887 }
 0x3bd   : > { %1517 = vmatmul.msk.f32.vlgmr.msra.gmra.mxu3 %vm641_vm8, %v888_v38 }
 0x3c4   : > { %v890_v39 = vpop.permute.xlu1 %889 }
 0x3c5   : > { %1518 = vmatmul.msk.f32.gmra.mxu3 %vm641_vm8, %v890_v39 }
 0x411   : > { %v727_v40 = vpop.f32.mrf.mxu2 }
 0x412   : > { %1513 = vmatmul.msk.f32.vlgmr.msra.gmra.mxu1 %vm641_vm8, %v727_v40 }
 0x419   : > { %v730_v41 = vpop.f32.mrf.mxu2 }
 0x41a   : > { %1514 = vmatmul.msk.f32.gmra.mxu1 %vm641_vm8, %v730_v41 }
 0x422   : > { %1525 = vmatmul.msk.f32.vlgmr.msrb.gmra.mxu1 %vm641_vm8, %v1015_v42 }
 0x42a   : > { %1526 = vmatmul.msk.f32.gmra.mxu1 %vm641_vm8, %v1017_v43  ;;  %v632_v43 = vld [vmem:[%s2028_s6 + $0x8] sm:$0xff] }
 0x42b   : > { %850 = vmatpush.msrb.mxu0 %v632_v43 }
 0x42f   : > { %v766_v44 = vpop.f32.mrf.mxu3 }
 0x430   : > { %v772_v45 = vsel %vm675_vm9, %v766_v44, -inf }
 0x431   : > { %773 = vmax.xlane.f32.xlu0 %v772_v45 }
 0x437   : > { %v769_v46 = vpop.f32.mrf.mxu3 }
 0x438   : > { %v775_v47 = vsel %vm675_vm9, %v769_v46, -inf }
 0x439   : > { %776 = vmax.xlane.f32.xlu1 %v775_v47 }
 0x440   : > { %v920_v48 = vpop.f32.mrf.mxu3 }
 0x441   : > { %v926_v49 = vsel %vm675_vm9, %v920_v48, -inf }
 0x442   : > { %927 = vmax.xlane.f32.xlu0 %v926_v49 }
 0x448   : > { %v923_v50 = vpop.f32.mrf.mxu3 }
 0x449   : > { %v929_v51 = vsel %vm675_vm9, %v923_v50, -inf }
 0x44a   : > { %930 = vmax.xlane.f32.xlu1 %v929_v51 }
 0x48f   : > { %v1845_v52 = vpop.f32.mrf.mxu1 }
 0x497   : > { %v1847_v53 = vpop.f32.mrf.mxu1 }
 0x49f   : > { %v1047_v54 = vpop.f32.mrf.mxu1 }
 0x4a0   : > { %v1053_v55 = vsel %vm675_vm9, %v1047_v54, -inf }
 0x4a1   : > { %1054 = vmax.xlane.f32.xlu2 %v1053_v55 }
 0x4a4   : > { %v774_v56 = vpop.xlane.xlu0 %773 }
 0x4a5   : > { %v778_v57 = vsub.f32 %v766_v44, %v774_v56 }
 0x4a7   : > { %v780_v58 = vmul.f32 1.442695, %v778_v57  ;;  %v1050_v59 = vpop.f32.mrf.mxu1 }
 0x4a8   : > { %v1056_v60 = vsel %vm675_vm9, %v1050_v59, -inf }
 0x4a9   : > { %1603 = vpow2.f32 %v780_v58  ;;  %1057 = vmax.xlane.f32.xlu2 %v1056_v60 }
 0x4ac   : > { %v777_v61 = vpop.xlane.xlu1 %776 }
 0x4ad   : > { %v779_v62 = vsub.f32 %v769_v46, %v777_v61  ;;  %v634_v46 = vld [vmem:[%s2028_s6 + $0x18] sm:$0xff] }
 0x4af   : > { %v1604_v63 = vpop.eup %1603  ;;  %v782_v0 = vmul.f32 1.442695, %v779_v62 }
 0x4b0   : > { %v784_v1 = vsel %vm675_vm9, %v1604_v63, 0.0 }
 0x4b1   : > { %1605 = vpow2.f32 %v782_v0  ;;  %785 = vadd.xlane.f32.xlu0 %v784_v1 }
 0x4b5   : > { %v928_v3 = vpop.xlane.xlu0 %927 }
 0x4b6   : > { %v932_v4 = vsub.f32 %v920_v48, %v928_v3 }
 0x4b7   : > { %v1606_v5 = vpop.eup %1605 }
 0x4b8   : > { %v934_v7 = vmul.f32 1.442695, %v932_v4  ;;  %v787_v9 = vsel %vm675_vm9, %v1606_v5, 0.0 }
 0x4b9   : > { %788 = vadd.xlane.f32.xlu1 %v787_v9 }
 0x4ba   : > { %1607 = vpow2.f32 %v934_v7 }
 0x4bd   : > { %v931_v16 = vpop.xlane.xlu1 %930 }
 0x4be   : > { %v933_v20 = vsub.f32 %v923_v50, %v931_v16 }
 0x4c0   : > { %v1608_v10 = vpop.eup %1607  ;;  %v936_v23 = vmul.f32 1.442695, %v933_v20 }
 0x4c1   : > { %1565 = vrot.lane.b32.xlu2 %v1813_v8, %s1656_s17  ;;  %v938_v11 = vsel %vm675_vm9, %v1608_v10, 0.0 }
 0x4c2   : > { %939 = vadd.xlane.f32.xlu1 %v938_v11  ;;  %v1582_v11 = vld [vmem:[%s2029_s7] ss:$0 sm:$0xff] }
 0x4c9   : > { %1575 = vrot.lane.b32.xlu2 %v1813_v8, %s1657_s18 }
 0x514   : > { %v1055_v12 = vpop.xlane.xlu2 %1054 }
 0x515   : > { %v1059_v13 = vsub.f32 %v1047_v54, %v1055_v12 }
 0x517   : > { %v1061_v15 = vmul.f32 1.442695, %v1059_v13 }
 0x519   : > { %1609 = vpow2.f32 %v1061_v15 }
 0x51c   : > { %v1058_v17 = vpop.xlane.xlu2 %1057 }
 0x51d   : > { %v1060_v18 = vsub.f32 %v1050_v59, %v1058_v17 }
 0x51f   : > { %v1610_v19 = vpop.eup %1609  ;;  %v1063_v21 = vmul.f32 1.442695, %v1060_v18 }
 0x520   : > { %v1065_v22 = vsel %vm675_vm9, %v1610_v19, 0.0 }
 0x521   : > { %1611 = vpow2.f32 %v1063_v21  ;;  %1066 = vadd.xlane.f32.xlu0 %v1065_v22 }
 0x524   : > { %v1566_v24 = vpop.permute.xlu2 %1565  ;;  %v786_v25 = vpop.xlane.xlu0 %785 }
 0x525   : > { %1613 = vrcp.f32 %v786_v25  ;;  %v1567_v26 = vunpack.i.l.bf16 %v1566_v24  ;;  %v1568_v28 = vunpack.i.h.bf16 %v1566_v24 }
 0x526   : > { %1615 = vpow2.f32 %v936_v23 }
 0x527   : > { %v1612_v27 = vpop.eup %1611  ;;  %820 = vmatpush.msrb.mxu2 %v1567_v26 }
 0x528   : > { %v1068_v29 = vsel %vm675_vm9, %v1612_v27, 0.0 }
 0x529   : > { %821 = vmatpush.msrb.mxu2 %v1568_v28  ;;  %1069 = vadd.xlane.f32.xlu1 %v1068_v29 }
 0x52b   : > { %v1614_v30 = vpop.eup %1613 }
 0x52c   : > { %v1576_v31 = vpop.permute.xlu2 %1575  ;;  %v789_v32 = vpop.xlane.xlu1 %788  ;;  %v792_v33 = vmul.f32 %v1614_v30, %v1604_v63  ;;  %v1208_v30 = vld [vmem:[%s2032_s10 + $0x18] sm:$0xff] }
 0x52d   : > { %v1616_v34 = vpop.eup %1615  ;;  %v1577_v35 = vunpack.i.l.bf16 %v1576_v31  ;;  %1617 = vrcp.f32 %v789_v32  ;;  %v1578_v36 = vunpack.i.h.bf16 %v1576_v31  ;;  %v1207_v31 = vld [vmem:[%s2032_s10 + $0x10] sm:$0xff]  ;;  %v1206_v32 = vld [vmem:[%s2032_s10 + $0x8] sm:$0xff] }
 0x52e   : > { %1509 = vmatmul.msk.f32.vlgmr.msrb.gmra.mxu2 %vm675_vm9, %v792_v33  ;;  %v941_v37 = vsel %vm675_vm9, %v1616_v34, 0.0  ;;  %v1205_v33 = vld [vmem:[%s2032_s10] sm:$0xff] }
 0x52f   : > { %974 = vmatpush.msra.mxu2 %v1577_v35 }
 0x531   : > { %975 = vmatpush.msra.mxu2 %v1578_v36  ;;  %942 = vadd.xlane.f32.xlu1 %v941_v37 }
 0x533   : > { %v1618_v38 = vpop.eup %1617  ;;  %1131 = vmatpush.msrb.mxu2 %v634_v46 }
 0x534   : > { %v793_v39 = vmul.f32 %v1618_v38, %v1606_v5 }
 0x535   : > { %1570 = vrot.lane.b32.xlu0 %v1813_v8, %s1658_s19  ;;  %v940_v40 = vpop.xlane.xlu1 %939  ;;  %v633_v8 = vld [vmem:[%s2028_s6 + $0x10] sm:$0xff] }
 0x536   : > { %1619 = vrcp.f32 %v940_v40  ;;  %1510 = vmatmul.msk.f32.gmra.mxu2 %vm675_vm9, %v793_v39  ;;  %1004 = vmatpush.msra.mxu0 %v633_v8 }
 0x53c   : > { %v1620_v41 = vpop.eup %1619 }
 0x53d   : > { %v946_v42 = vmul.f32 %v1620_v41, %v1608_v10 }
 0x53f   : > { %1519 = vmatmul.msk.f32.vlgmr.msra.gmra.mxu2 %vm675_vm9, %v946_v42 }
 0x594   : > { %v1067_v45 = vpop.xlane.xlu0 %1066 }
 0x595   : > { %1621 = vrcp.f32 %v1067_v45 }
 0x59b   : > { %v1622_v49 = vpop.eup %1621 }
 0x59c   : > { %v1070_v44 = vpop.xlane.xlu1 %1069  ;;  %v1073_v55 = vmul.f32 %v1622_v49, %v1610_v19 }
 0x5a4   : > { %v943_v47 = vpop.xlane.xlu1 %942 }
 0x5a5   : > { %1623 = vrcp.f32 %v943_v47  ;;  %v1583_v47 = vld [vmem:[%s2030_s8] ss:$0 sm:$0xff] }
 0x5a6   : > { %1625 = vrcp.f32 %v1070_v44 }
 0x5a7   : > { %v1571_v48 = vpop.permute.xlu0 %1570 }
 0x5a8   : > { %v1572_v50 = vunpack.i.l.bf16 %v1571_v48  ;;  %v1573_v51 = vunpack.i.h.bf16 %v1571_v48 }
 0x5aa   : > { %1101 = vmatpush.msrb.mxu3 %v1572_v50 }
 0x5ab   : > { %v1624_v54 = vpop.eup %1623 }
 0x5ac   : > { %1102 = vmatpush.msrb.mxu3 %v1573_v51  ;;  %v947_v56 = vmul.f32 %v1624_v54, %v1616_v34  ;;  %v1626_v57 = vpop.eup %1625  ;;  %v1584_v51 = vld [vmem:[%s2031_s9] ss:$0 sm:$0xff] }
 0x5ad   : > { %1527 = vmatmul.msk.f32.vlgmr.msrb.gmra.mxu3 %vm675_vm9, %v1073_v55  ;;  %v1074_v59 = vmul.f32 %v1626_v57, %v1612_v27 }
 0x5ae   : > { %1520 = vmatmul.msk.f32.gmra.mxu2 %vm675_vm9, %v947_v56 }
 0x5b1   : > { %v823_v58 = vpop.f32.mrf.mxu2 }
 0x5b2   : > { %1511 = vmatmul.msk.f32.vlgmr.msrb.gmra.mxu0 %vm641_vm8, %v823_v58 }
 0x5b3   : > { %1231 = vmatpush.msrb.mxu0 %v1208_v30  ;;  %v1333_v30 = vld [vmem:[%s2034_s12 + $0x18] sm:$0xff] }
 0x5b5   : > { %1528 = vmatmul.msk.f32.gmra.mxu3 %vm675_vm9, %v1074_v59  ;;  %1232 = vmatpush.msrb.mxu0 %v1207_v31 }
 0x5b7   : > { %1233 = vmatpush.msrb.mxu0 %v1206_v32 }
 0x5b9   : > { %v826_v60 = vpop.f32.mrf.mxu2  ;;  %1234 = vmatpush.msrb.mxu0 %v1205_v33 }
 0x5ba   : > { %1512 = vmatmul.msk.f32.gmra.mxu0 %vm641_vm8, %v826_v60 }
 0x5c2   : > { %v977_v61 = vpop.f32.mrf.mxu2 }
 0x5c3   : > { %1521 = vmatmul.msk.f32.vlgmr.msra.gmra.mxu0 %vm641_vm8, %v977_v61 }
 0x62f   : > { %v852_v1 = vpop.f32.mrf.mxu0 }
 0x630   : > { %v1104_v62 = vpop.f32.mrf.mxu3  ;;  %v882_v5 = vadd.f32 %v1845_v52, %v852_v1  ;;  %v1343_v1 = vld [vmem:[%s2034_s12 + $0x68] sm:$0xff] }
 0x631   : > { %v980_v63 = vpop.f32.mrf.mxu2  ;;  %1529 = vmatmul.msk.f32.vlgmr.msrb.gmra.mxu2 %vm641_vm8, %v1104_v62 }
 0x632   : > { %1522 = vmatmul.msk.f32.gmra.mxu0 %vm641_vm8, %v980_v63  ;;  %v1345_v63 = vld [vmem:[%s2034_s12 + $0x78] sm:$0xff] }
 0x633   : > { %1350 = vmatpush.msra.mxu1 %v1345_v63 }
 0x637   : > { %v855_v3 = vpop.f32.mrf.mxu0 }
 0x638   : > { %v1107_v0 = vpop.f32.mrf.mxu3  ;;  %v885_v15 = vadd.f32 %v1847_v53, %v855_v3  ;;  %v1585_v3 = vld [vmem:[%s2033_s11] ss:$0 sm:$0xff] }
 0x639   : > { %1530 = vmatmul.msk.f32.gmra.mxu2 %vm641_vm8, %v1107_v0  ;;  %v1344_v0 = vld [vmem:[%s2034_s12 + $0x70] sm:$0xff] }
 0x63a   : > { %1351 = vmatpush.msra.mxu1 %v1344_v0 }
 0x63c   : > { %1352 = vmatpush.msra.mxu1 %v1343_v1 }
 0x640   : > { %v1006_v4 = vpop.f32.mrf.mxu0 }
 0x641   : > { %v1012_v7 = vadd.f32 %v1006_v4, %v882_v5  ;;  %v1342_v4 = vld [vmem:[%s2034_s12 + $0x60] sm:$0xff]  ;;  %v1341_v5 = vld [vmem:[%s2034_s12 + $0x58] sm:$0xff] }
 0x642   : > { %1353 = vmatpush.msra.mxu1 %v1342_v4 }
 0x644   : > { %1354 = vmatpush.msra.mxu1 %v1341_v5 }
 0x6af   : > { %v1009_v13 = vpop.f32.mrf.mxu0 }
 0x6b0   : > { %v1013_v17 = vadd.f32 %v1009_v13, %v885_v15  ;;  %v1338_v15 = vld [vmem:[%s2034_s12 + $0x40] sm:$0xff] }
 0x6b4   : > { %v1133_v9 = vpop.f32.mrf.mxu2 }
 0x6b5   : > { %v1139_v10 = vadd.f32 %v1133_v9, %v1012_v7 }
 0x6b7   : > { %v1141_v12 = vadd.f32 %v1139_v10, %v1763_v2  ;;  %v1340_v10 = vld [vmem:[%s2034_s12 + $0x50] sm:$0xff] }
 0x6b8   : > { %1355 = vmatpush.msra.mxu1 %v1340_v10 }
 0x6b9   : > { %v1887_v16 = vadd.f32 %v1582_v11, %v1141_v12  ;;  %v1339_v12 = vld [vmem:[%s2034_s12 + $0x48] sm:$0xff] }
 0x6ba   : > { %1356 = vmatpush.msra.mxu1 %v1339_v12 }
 0x6bb   : > { %v1149_v18 = vsel %vm528_vm0, %v1887_v16, 0.0 }
 0x6bc   : > { %1150 = vadd.xlane.f32.xlu0 %v1149_v18  ;;  %v1136_v52 = vpop.f32.mrf.mxu2  ;;  %1357 = vmatpush.msra.mxu1 %v1338_v15  ;;  %v1337_v18 = vld [vmem:[%s2034_s12 + $0x38] sm:$0xff] }
 0x6bd   : > { %v1140_v19 = vadd.f32 %v1136_v52, %v1013_v17 }
 0x6be   : > { %1358 = vmatpush.msra.mxu1 %v1337_v18 }
 0x6bf   : > { %v1142_v20 = vadd.f32 %v1140_v19, %v1770_v6 }
 0x6c1   : > { %v1892_v21 = vadd.f32 %v1582_v11, %v1142_v20 }
 0x6c3   : > { %v1152_v22 = vsel %vm528_vm0, %v1892_v21, 0.0 }
 0x6c4   : > { %1153 = vadd.xlane.f32.xlu2 %v1152_v22 }
 0x72f   : > { %v1151_v2 = vpop.xlane.xlu0 %1150 }
 0x730   : > { %v1155_v53 = vmul.f32 %v1151_v2, %v1774_v14  ;;  %v1336_v2 = vld [vmem:[%s2034_s12 + $0x30] sm:$0xff] }
 0x731   : > { %1359 = vmatpush.msra.mxu1 %v1336_v2 }
 0x732   : > { %v1157_v23 = vsub.f32 %v1887_v16, %v1155_v53 }
 0x734   : > { %v1159_v24 = vmul.f32 %v1157_v23, %v1157_v23 }
 0x736   : > { %v1161_v25 = vsel %vm528_vm0, %v1159_v24, 0.0  ;;  %v1335_v24 = vld [vmem:[%s2034_s12 + $0x28] sm:$0xff] }
 0x737   : > { %1162 = vadd.xlane.f32.xlu1 %v1161_v25  ;;  %v1154_v26 = vpop.xlane.xlu2 %1153  ;;  %1360 = vmatpush.msra.mxu1 %v1335_v24 }
 0x738   : > { %v1156_v27 = vmul.f32 %v1154_v26, %v1774_v14 }
 0x73a   : > { %v1158_v6 = vsub.f32 %v1892_v21, %v1156_v27 }
 0x73c   : > { %v1160_v28 = vmul.f32 %v1158_v6, %v1158_v6 }
 0x73e   : > { %v1164_v29 = vsel %vm528_vm0, %v1160_v28, 0.0 }
 0x73f   : > { %1165 = vadd.xlane.f32.xlu1 %v1164_v29 }
 0x7aa   : > { %v1163_v34 = vpop.xlane.xlu1 %1162 }
 0x7ab   : > { %v1167_v35 = vmul.f32 %v1163_v34, %v1774_v14  ;;  %v1332_v34 = vld [vmem:[%s2034_s12 + $0x10] sm:$0xff] }
 0x7ad   : > { %v1169_v36 = vadd.f32 1e-06, %v1167_v35 }
 0x7af   : > { %1627 = vrsqrt.f32 %v1169_v36  ;;  %vm1177_vm11 = vweird.f32 %v1169_v36 }
 0x7b2   : > { %v1166_v37 = vpop.xlane.xlu1 %1165 }
 0x7b3   : > { %v1168_v38 = vmul.f32 %v1166_v37, %v1774_v14 }
 0x7b5   : > { %v1628_v39 = vpop.eup %1627  ;;  %v1170_v40 = vadd.f32 1e-06, %v1168_v38  ;;  %v1331_v38 = vld [vmem:[%s2034_s12 + $0x8] sm:$0xff] }
 0x7b6   : > { %v1172_v41 = vmul.f32 %v1628_v39, %v1169_v36  ;;  %vm1178_vm10 = vweird.f32 %v1628_v39 }
 0x7b7   : > { %1629 = vrsqrt.f32 %v1170_v40  ;;  %vm1179_vm12 = vmor %vm1177_vm11, %vm1178_vm10  ;;  %vm1187_vm14 = vweird.f32 %v1170_v40 }
 0x7b8   : > { %v1173_v42 = vmul.f32 %v1628_v39, %v1172_v41  ;;  %v1330_v41 = vld [vmem:[%s2034_s12] sm:$0xff] }
 0x7ba   : > { %v1174_v43 = vmul.f32 0.5, %v1173_v42 }
 0x7bc   : > { %v1175_v44 = vsub.f32 1.5, %v1174_v43 }
 0x7bd   : > { %v1630_v45 = vpop.eup %1629 }
 0x7be   : > { %v1176_v8 = vmul.f32 %v1628_v39, %v1175_v44  ;;  %v1182_v46 = vmul.f32 %v1630_v45, %v1170_v40  ;;  %vm1188_vm13 = vweird.f32 %v1630_v45 }
 0x7bf   : > { %vm1189_vm15 = vmor %vm1187_vm14, %vm1188_vm13 }
 0x7c0   : > { %v1180_v48 = vsel %vm1179_vm12, %v1628_v39, %v1176_v8  ;;  %v1183_v49 = vmul.f32 %v1630_v45, %v1182_v46 }
 0x7c1   : > { %v1191_v50 = vmul.f32 %v1180_v48, %v1157_v23 }
 0x7c2   : > { %v1184_v54 = vmul.f32 0.5, %v1183_v49 }
 0x7c3   : > { %v1197_v55 = vmul.f32 %v1583_v47, %v1191_v50 }
 0x7c4   : > { %v1185_v56 = vsub.f32 1.5, %v1184_v54 }
 0x7c5   : > { %v1203_v57 = vadd.f32 %v1584_v51, %v1197_v55 }
 0x7c6   : > { %v1186_v58 = vmul.f32 %v1630_v45, %v1185_v56 }
 0x7c7   : > { %1531 = vmatmul.msk.f32.vlgmr.msrb.gmra.mxu0 %vm528_vm0, %v1203_v57 }
 0x7c8   : > { %v1190_v59 = vsel %vm1189_vm15, %v1630_v45, %v1186_v58 }
 0x7c9   : > { %v1192_v60 = vmul.f32 %v1190_v59, %v1158_v6  ;;  %v1334_v6 = vld [vmem:[%s2034_s12 + $0x20] sm:$0xff] }
 0x7ca   : > { %1361 = vmatpush.msra.mxu1 %v1334_v6 }
 0x7cb   : > { %v1198_v61 = vmul.f32 %v1583_v47, %v1192_v60 }
 0x7cc   : > { %1362 = vmatpush.msra.mxu1 %v1333_v30 }
 0x7cd   : > { %v1204_v62 = vadd.f32 %v1584_v51, %v1198_v61 }
 0x7ce   : > { %1363 = vmatpush.msra.mxu1 %v1332_v34 }
 0x7cf   : > { %1532 = vmatmul.msk.f32.gmra.mxu0 %vm528_vm0, %v1204_v62 }
 0x7d0   : > { %1364 = vmatpush.msra.mxu1 %v1331_v38 }
 0x7d2   : > { %1365 = vmatpush.msra.mxu1 %v1330_v41 }
 0x844   : > { %v1236_v7 = vpop.f32.mrf.mxu0 }
 0x845   : > { %v1942_v9 = vadd.f32 %v1585_v3, %v1236_v7 }
 0x847   : > { %v1948_v11 = vmul.f32 0.70710677, %v1942_v9  ;;  %v1242_v30 = vmul.f32 0.5, %v1942_v9  ;;  %v1586_v9 = vld [vmem:[%s2035_s13] ss:$0 sm:$0xff] }
 0x849   : > { %v1246_v13 = vmul.f32 %v1948_v11, %v1948_v11 }
 0x84b   : > { %v1247_v17 = vmin.f32 %v1246_v13, 16.0 }
 0x84c   : > { %v1239_v52 = vpop.f32.mrf.mxu0 }
 0x84d   : > { %v1248_v19 = vmul.f32 2.1237322e-06, %v1247_v17  ;;  %v1259_v20 = vmul.f32 3.8918573e-05, %v1247_v17  ;;  %v1961_v22 = vadd.f32 %v1585_v3, %v1239_v52 }
 0x84f   : > { %v1249_v53 = vadd.f32 0.00028619796, %v1248_v19  ;;  %v1260_v23 = vadd.f32 0.001143296, %v1259_v20  ;;  %v1970_v25 = vmul.f32 0.70710677, %v1961_v22 }
 0x851   : > { %v1250_v26 = vmul.f32 %v1249_v53, %v1247_v17  ;;  %v1261_v27 = vmul.f32 %v1260_v23, %v1247_v17  ;;  %v1286_v28 = vmul.f32 %v1970_v25, %v1970_v25 }
 0x853   : > { %v1262_v29 = vadd.f32 0.014752088, %v1261_v27  ;;  %v1251_v31 = vadd.f32 0.0036580483, %v1250_v26  ;;  %v1287_v32 = vmin.f32 %v1286_v28, 16.0 }
 0x855   : > { %v1263_v33 = vmul.f32 %v1262_v29, %v1247_v17  ;;  %v1288_v35 = vmul.f32 2.1237322e-06, %v1287_v32  ;;  %v1299_v36 = vmul.f32 3.8918573e-05, %v1287_v32  ;;  %v1252_v39 = vmul.f32 %v1251_v31, %v1247_v17 }
 0x857   : > { %v1264_v37 = vadd.f32 0.112945676, %v1263_v33  ;;  %v1289_v40 = vadd.f32 0.00028619796, %v1288_v35  ;;  %v1300_v42 = vadd.f32 0.001143296, %v1299_v36 }
 0x858   : > { %v1253_v46 = vadd.f32 0.05243302, %v1252_v39  ;;  %v1243_v39 = vmul.f32 0.5, %v1961_v22 }
 0x859   : > { %v1265_v43 = vmul.f32 %v1264_v37, %v1247_v17  ;;  %v1290_v44 = vmul.f32 %v1289_v40, %v1287_v32  ;;  %v1301_v45 = vmul.f32 %v1300_v42, %v1287_v32 }
 0x85a   : > { %v1254_v54 = vmul.f32 %v1253_v46, %v1247_v17 }
 0x85b   : > { %v1266_v8 = vadd.f32 0.4994258, %v1265_v43  ;;  %v1302_v47 = vadd.f32 0.014752088, %v1301_v45  ;;  %v1291_v49 = vadd.f32 0.0036580483, %v1290_v44 }
 0x85c   : > { %v1255_v58 = vadd.f32 0.18741608, %v1254_v54 }
 0x85d   : > { %v1267_v48 = vmul.f32 %v1266_v8, %v1247_v17  ;;  %v1303_v50 = vmul.f32 %v1302_v47, %v1287_v32  ;;  %v1292_v56 = vmul.f32 %v1291_v49, %v1287_v32 }
 0x85e   : > { %v1256_v63 = vmul.f32 %v1255_v58, %v1247_v17 }
 0x85f   : > { %v1268_v51 = vadd.f32 1.0, %v1267_v48  ;;  %v1304_v55 = vadd.f32 0.112945676, %v1303_v50  ;;  %v1293_v60 = vadd.f32 0.05243302, %v1292_v56 }
 0x860   : > { %v1257_v7 = vadd.f32 1.1283791, %v1256_v63 }
 0x861   : > { %1631 = vrcp.f32 %v1268_v51  ;;  %v1305_v57 = vmul.f32 %v1304_v55, %v1287_v32  ;;  %v1294_v3 = vmul.f32 %v1293_v60, %v1287_v32  ;;  %v1280_v5 = vand.u32 2147483648, %v1268_v51 }
 0x862   : > { %v1278_v12 = vand.u32 2147483647, %v1268_v51  ;;  %vm1274_vm2 = vweird.f32 %v1268_v51  ;;  %v1258_v19 = vmul.f32 %v1257_v7, %v1948_v11 }
 0x863   : > { %v1306_v59 = vadd.f32 0.4994258, %v1305_v57  ;;  %v1295_v13 = vadd.f32 0.18741608, %v1294_v3  ;;  %v1281_v18 = vor.u32 1.1754944e-38, %v1280_v5 }
 0x864   : > { %vm1279_vm4 = vcmp.eq.f32.partialorder %v1278_v12, 8.507059e+37 }
 0x865   : > { %v1307_v61 = vmul.f32 %v1306_v59, %v1287_v32  ;;  %v1296_v2 = vmul.f32 %v1295_v13, %v1287_v32 }
 0x867   : > { %v1632_v62 = vpop.eup %1631  ;;  %v1308_v1 = vadd.f32 1.0, %v1307_v61  ;;  %v1297_v6 = vadd.f32 1.1283791, %v1296_v2 }
 0x868   : > { %v1270_v0 = vmul.f32 %v1632_v62, %v1268_v51  ;;  %vm1275_vm1 = vweird.f32 %v1632_v62 }
 0x869   : > { %1633 = vrcp.f32 %v1308_v1  ;;  %vm1276_vm3 = vmor %vm1274_vm2, %vm1275_vm1  ;;  %v1320_v27 = vand.u32 2147483648, %v1308_v1  ;;  %v1318_v29 = vand.u32 2147483647, %v1308_v1  ;;  %vm1314_vm6 = vweird.f32 %v1308_v1 }
 0x86a   : > { %v1271_v4 = vsub.f32 1.0, %v1270_v0  ;;  %v1298_v35 = vmul.f32 %v1297_v6, %v1970_v25 }
 0x86b   : > { %v1321_v11 = vor.u32 1.1754944e-38, %v1320_v27  ;;  %vm1319_vm8 = vcmp.eq.f32.partialorder %v1318_v29, 8.507059e+37 }
 0x86c   : > { %v1272_v10 = vmul.f32 %v1632_v62, %v1271_v4 }
 0x86e   : > { %v1273_v15 = vadd.f32 %v1632_v62, %v1272_v10  ;;  %v1587_v10 = vld [vmem:[%s2036_s14] ss:$0 sm:$0xff] }
 0x86f   : > { %v1634_v52 = vpop.eup %1633 }
 0x870   : > { %v1277_v20 = vsel %vm1276_vm3, %v1632_v62, %v1273_v15  ;;  %v1310_v53 = vmul.f32 %v1634_v52, %v1308_v1  ;;  %vm1315_vm5 = vweird.f32 %v1634_v52 }
 0x871   : > { %v1282_v17 = vsel %vm1279_vm4, %v1281_v18, %v1277_v20  ;;  %vm1316_vm7 = vmor %vm1314_vm6, %vm1315_vm5 }
 0x872   : > { %v1283_v23 = vmul.f32 %v1282_v17, %v1258_v19  ;;  %v1311_v24 = vsub.f32 1.0, %v1310_v53 }
 0x874   : > { %v1533_v26 = vclamps-f32 %v1283_v23, 1.0  ;;  %v1312_v28 = vmul.f32 %v1634_v52, %v1311_v24 }
 0x876   : > { %v1326_v31 = vadd.f32 1.0, %v1533_v26  ;;  %v1313_v33 = vadd.f32 %v1634_v52, %v1312_v28 }
 0x878   : > { %v1328_v34 = vmul.f32 %v1326_v31, %v1242_v30  ;;  %v1317_v32 = vsel %vm1316_vm7, %v1634_v52, %v1313_v33 }
 0x879   : > { %v1322_v36 = vsel %vm1319_vm8, %v1321_v11, %v1317_v32 }
 0x87a   : > { %1366 = vmatmul.f32.vlgmr.msra.gmra.mxu1 %v1328_v34  ;;  %v1323_v37 = vmul.f32 %v1322_v36, %v1298_v35 }
 0x87c   : > { %v1534_v38 = vclamps-f32 %v1323_v37, 1.0 }
 0x87e   : > { %v1327_v40 = vadd.f32 1.0, %v1534_v38 }
 0x880   : > { %v1329_v41 = vmul.f32 %v1327_v40, %v1243_v39 }
 0x882   : > { %1369 = vmatmul.f32.gmra.mxu1 %v1329_v41 }
 0x8f7   : > { %v1367_v42 = vpop.f32.mrf.mxu1 }
 0x8f8   : > { %v1368_v43 = vadd.f32 %v1586_v9, %v1367_v42 }
 0x8fa   : > { %v1373_v44 = vadd.f32 %v1368_v43, %v1887_v16 }
 0x8fc   : > { %v1375_v25 = vsel %vm528_vm0, %v1373_v44, 0.0 }
 0x8fd   : > { %1376 = vadd.xlane.f32.xlu1 %v1375_v25 }
 0x8ff   : > { %v1370_v45 = vpop.f32.mrf.mxu1 }
 0x900   : > { %v1371_v8 = vadd.f32 %v1586_v9, %v1370_v45 }
 0x902   : > { %v1374_v46 = vadd.f32 %v1371_v8, %v1892_v21 }
 0x904   : > { %v1378_v22 = vsel %vm528_vm0, %v1374_v46, 0.0 }
 0x905   : > { %1379 = vadd.xlane.f32.xlu1 %v1378_v22 }
 0x970   : > { %v1377_v47 = vpop.xlane.xlu1 %1376 }
 0x971   : > { %v1381_v48 = vmul.f32 %v1377_v47, %v1774_v14 }
 0x973   : > { %v1383_v49 = vsub.f32 %v1373_v44, %v1381_v48 }
 0x975   : > { %v1385_v50 = vmul.f32 %v1383_v49, %v1383_v49 }
 0x977   : > { %v1387_v51 = vsel %vm528_vm0, %v1385_v50, 0.0 }
 0x978   : > { %1388 = vadd.xlane.f32.xlu1 %v1387_v51  ;;  %v1380_v54 = vpop.xlane.xlu1 %1379 }
 0x979   : > { %v1382_v16 = vmul.f32 %v1380_v54, %v1774_v14 }
 0x97b   : > { %v1384_v55 = vsub.f32 %v1374_v46, %v1382_v16 }
 0x97d   : > { %v1386_v56 = vmul.f32 %v1384_v55, %v1384_v55 }
 0x97f   : > { %v1390_v57 = vsel %vm528_vm0, %v1386_v56, 0.0 }
 0x980   : > { %1391 = vadd.xlane.f32.xlu1 %v1390_v57 }
 0x9eb   : > { %v1389_v21 = vpop.xlane.xlu1 %1388 }
 0x9ec   : > { %v1393_v58 = vmul.f32 %v1389_v21, %v1774_v14 }
 0x9ee   : > { %v1395_v59 = vadd.f32 1e-06, %v1393_v58 }
 0x9f0   : > { %1635 = vrsqrt.f32 %v1395_v59  ;;  %vm1403_vm10 = vweird.f32 %v1395_v59 }
 0x9f3   : > { %v1392_v60 = vpop.xlane.xlu1 %1391 }
 0x9f4   : > { %v1394_v61 = vmul.f32 %v1392_v60, %v1774_v14  ;;  %v1588_v14 = vld [vmem:[%s2037_s15] ss:$0 sm:$0xff] }
 0x9f6   : > { %v1636_v62 = vpop.eup %1635  ;;  %v1396_v0 = vadd.f32 1e-06, %v1394_v61 }
 0x9f7   : > { %v1398_v63 = vmul.f32 %v1636_v62, %v1395_v59  ;;  %vm1404_vm9 = vweird.f32 %v1636_v62 }
 0x9f8   : > { %1637 = vrsqrt.f32 %v1396_v0  ;;  %vm1405_vm11 = vmor %vm1403_vm10, %vm1404_vm9  ;;  %vm1413_vm13 = vweird.f32 %v1396_v0 }
 0x9f9   : > { %v1399_v1 = vmul.f32 %v1636_v62, %v1398_v63 }
 0x9fb   : > { %v1400_v3 = vmul.f32 0.5, %v1399_v1 }
 0x9fd   : > { %v1401_v4 = vsub.f32 1.5, %v1400_v3 }
 0x9fe   : > { %v1638_v5 = vpop.eup %1637 }
 0x9ff   : > { %v1402_v7 = vmul.f32 %v1636_v62, %v1401_v4  ;;  %v1408_v12 = vmul.f32 %v1638_v5, %v1396_v0  ;;  %vm1414_vm12 = vweird.f32 %v1638_v5 }
 0xa00   : > { %vm1415_vm14 = vmor %vm1413_vm13, %vm1414_vm12 }
 0xa01   : > { %v1406_v13 = vsel %vm1405_vm11, %v1636_v62, %v1402_v7  ;;  %v1409_v18 = vmul.f32 %v1638_v5, %v1408_v12 }
 0xa02   : > { %v1417_v15 = vmul.f32 %v1406_v13, %v1383_v49 }
 0xa03   : > { %v1410_v19 = vmul.f32 0.5, %v1409_v18 }
 0xa04   : > { %v1423_v52 = vmul.f32 %v1587_v10, %v1417_v15 }
 0xa05   : > { %v1411_v17 = vsub.f32 1.5, %v1410_v19 }
 0xa06   : > { %v1429_v20 = vadd.f32 %v1588_v14, %v1423_v52 }
 0xa07   : > { %v1412_v2 = vmul.f32 %v1638_v5, %v1411_v17 }
 0xa08   : > { %1431 = vst.msk [vmem:[%s521_s25] sm:$0xff] %vm528_vm0, %v1429_v20 }
 0xa09   : > { %v1416_v53 = vsel %vm1415_vm14, %v1638_v5, %v1412_v2 }
 0xa0a   : > { %v1418_v23 = vmul.f32 %v1416_v53, %v1384_v55 }
 0xa0c   : > { %v1424_v24 = vmul.f32 %v1587_v10, %v1418_v23 }
 0xa0e   : > { %v1430_v26 = vadd.f32 %v1588_v14, %v1424_v24 }
 0xa10   : > { %1432 = vst.msk [vmem:[%s521_s25 + $0x8] sm:$0xff] %vm528_vm0, %v1430_v26 }
 0xa11 PF: > { %s26_s21 = sadd.s32 1, %s1645_s21  }
 0xa12   : > { %p23_p4 = scmp.ge.s32.totalorder %s26_s21, 18  }
 0xa14   :  { %25 = sbr.rel (!%p23_p4) target bundleno = 2 (0x2), region = 114 }

</bundles_post_ra>
